<compile_context>
chip_gen: v7x
topology: tpu7x:2x2x1
jax: 0.10.0
libtpu: 0.0.40
codegen_flags: <defaults>
</compile_context>

<pallas_src>
import functools

import jax
import jax.numpy as jnp
from jax import lax
from jax.experimental import pallas as pl
from jax.experimental.pallas import tpu as pltpu


def _mfa_kernel(xf_ref, x1_ref, x2_ref, w_ref, sc_ref, sh_ref, o_ref, *, H, W):
    """One batch element per grid step.

    xf_ref/x1_ref/x2_ref: (1, Hp*Wp, C)  flattened, spatially zero-padded NHWC
    w_ref:                (3, 3, 2C, C)  conv weight acting on concat([m1, m2])
    sc_ref/sh_ref:        (1, C)         folded conv-bias + BatchNorm scale/shift
    o_ref:                (1, H*Wp, C)   width-padded, flattened-spatial output
    """
    _, _, C = xf_ref.shape
    Wp = W + 2
    n_out = H * Wp

    # Elementwise products stay in f32 on the VPU (v5e VPU has no bf16);
    # the MXU operands are cast once to the weight dtype (bf16 by default).
    xf = xf_ref[0].astype(jnp.float32)                      # (Hp*Wp, C)
    m1 = xf * x1_ref[0].astype(jnp.float32)                 # x_ful * x1
    m2 = xf * x2_ref[0].astype(jnp.float32)                 # x_ful * x2
    m_cat = jnp.concatenate([m1, m2], axis=-1).astype(w_ref.dtype)  # (Hp*Wp, 2C)

    # 3x3 conv as 9 taps of (H*Wp, 2C) @ (2C, C).  dy -> contiguous sublane
    # slice of m_cat; dx -> shift of the accumulators afterwards.  Three
    # independent accumulators keep MXU-result adds off one serial chain.
    accs = [jnp.zeros((n_out, C), jnp.float32) for _ in range(3)]
    for dy in range(3):
        slab = lax.slice_in_dim(m_cat, dy * Wp, dy * Wp + n_out, axis=0)
        for dx in range(3):
            accs[dx] = accs[dx] + jnp.dot(
                slab, w_ref[dy, dx, :, :], preferred_element_type=jnp.float32)

    def shift_up(a, k):
        # a[r + k]; the k rows that fall off the end only ever land in the
        # padded output columns (w >= W), which the wrapper discards.
        if k == 0:
            return a
        return jnp.concatenate(
            [lax.slice_in_dim(a, k, n_out, axis=0),
             jnp.zeros((k, C), jnp.float32)], axis=0)

    xw = accs[0] + shift_up(accs[1], 1) + shift_up(accs[2], 2)

    # conv bias + inference BatchNorm folded into a single per-channel affine.
    xw = xw * sc_ref[...] + sh_ref[...]

    # Residual = interior of the already-loaded padded x_ful:
    # flat padded index of (h+1, w+1) is (h*Wp + w) + Wp + 1.
    res = lax.slice_in_dim(xf, Wp + 1, Wp + 1 + n_out, axis=0)

    o_ref[0] = jnp.maximum(res + xw, 0.0).astype(o_ref.dtype)


def mfa_forward(x_ful, x1, x2, conv_w, conv_b,
                bn_gamma, bn_beta, bn_mean, bn_var, *,
                eps=1e-5, mxu_dtype=jnp.bfloat16):
    """MFA forward.  Inputs/outputs are NCHW to match the PyTorch module."""
    N, C, H, W = x_ful.shape
    assert conv_w.shape == (C, 2 * C, 3, 3)
    Hp, Wp = H + 2, W + 2

    def prep(t):
        # NCHW -> zero-padded NHWC -> flattened spatial.  XLA fuses the
        # transpose+pad+reshape into one pass per input.
        t = jnp.transpose(t, (0, 2, 3, 1))
        t = jnp.pad(t, ((0, 0), (1, 1), (1, 1), (0, 0)))
        return t.reshape(N, Hp * Wp, C)

    xf_p, x1_p, x2_p = prep(x_ful), prep(x1), prep(x2)

    # (O=C, I=2C, kh, kw) -> (kh, kw, 2C, C): single weight over the channel
    # concat -> 9 matmuls with K=2C instead of 18 with K=C.
    w_cat = jnp.transpose(conv_w, (2, 3, 1, 0)).astype(mxu_dtype)

    # Fold conv bias + BatchNorm (inference) into one affine per channel.
    scale = bn_gamma / jnp.sqrt(bn_var + eps)
    shift = (conv_b - bn_mean) * scale + bn_beta
    scale2 = scale.reshape(1, C).astype(jnp.float32)
    shift2 = shift.reshape(1, C).astype(jnp.float32)

    # Explicit VMEM budget for the per-step working set (capped for v7x).
    in_b = jnp.dtype(x_ful.dtype).itemsize
    w_b = jnp.dtype(mxu_dtype).itemsize
    est = (3 * Hp * Wp * C * in_b * 2          # double-buffered input blocks
           + H * Wp * C * in_b * 2             # double-buffered output block
           + 9 * 2 * C * C * w_b * 2           # conv weights
           + (5 * Hp * Wp * C + 4 * H * Wp * C) * 4)  # f32/bf16 intermediates
    vmem_limit = int(min(max(2 * est, 32 * 1024 * 1024), 64 * 1024 * 1024))

    kernel = functools.partial(_mfa_kernel, H=H, W=W)
    # NOTE: weights / scale / shift have constant index_maps; with a
    # pipeline_mode=pl.Buffered(1) hint their second pipeline buffer could be
    # dropped on VMEM-tight v7x configs.
    out_flat = pl.pallas_call(
        kernel,
        out_shape=jax.ShapeDtypeStruct((N, H * Wp, C), x_ful.dtype),
        grid_spec=pltpu.PrefetchScalarGridSpec(
            num_scalar_prefetch=0,
            grid=(N,),
            in_specs=[
                pl.BlockSpec((1, Hp * Wp, C), lambda b: (b, 0, 0)),
                pl.BlockSpec((1, Hp * Wp, C), lambda b: (b, 0, 0)),
                pl.BlockSpec((1, Hp * Wp, C), lambda b: (b, 0, 0)),
                pl.BlockSpec((3, 3, 2 * C, C), lambda b: (0, 0, 0, 0)),
                pl.BlockSpec((1, C), lambda b: (0, 0)),
                pl.BlockSpec((1, C), lambda b: (0, 0)),
            ],
            out_specs=pl.BlockSpec((1, H * Wp, C), lambda b: (b, 0, 0)),
        ),
        compiler_params=pltpu.CompilerParams(
            dimension_semantics=("parallel",),
            vmem_limit_bytes=vmem_limit,
        ),
    )(xf_p, x1_p, x2_p, w_cat, scale2, shift2)

    # Drop the padded columns and return NCHW (slice fuses with the transpose).
    out = out_flat.reshape(N, H, Wp, C)[:, :, :W, :]
    return jnp.transpose(out, (0, 3, 1, 2))


def mfa_ref(x_ful, x1, x2, conv_w, conv_b,
            bn_gamma, bn_beta, bn_mean, bn_var, *, eps=1e-5):
    """Pure-JAX reference (independent formulation via lax.conv)."""
    m1 = x_ful * x1
    m2 = x_ful * x2
    xcat = jnp.concatenate([m1, m2], axis=1)
    conv = lax.conv_general_dilated(
        xcat, conv_w, window_strides=(1, 1), padding=((1, 1), (1, 1)),
        dimension_numbers=("NCHW", "OIHW", "NCHW"),
        precision=lax.Precision.HIGHEST)
    conv = conv + conv_b[None, :, None, None]
    inv = (bn_gamma / jnp.sqrt(bn_var + eps))[None, :, None, None]
    bn = (conv - bn_mean[None, :, None, None]) * inv + bn_beta[None, :, None, None]
    return jnp.maximum(x_ful + bn, 0.0)


if __name__ == "__main__":
    key = jax.random.PRNGKey(0)
    k = jax.random.split(key, 9)

    N, C, H, W = 2, 4, 16, 16
    x_ful = jax.random.normal(k[0], (N, C, H, W), jnp.float32)
    x1 = jax.random.normal(k[1], (N, C, H, W), jnp.float32)
    x2 = jax.random.normal(k[2], (N, C, H, W), jnp.float32)

    conv_w = 0.1 * jax.random.normal(k[3], (C, 2 * C, 3, 3), jnp.float32)
    conv_b = 0.1 * jax.random.normal(k[4], (C,), jnp.float32)
    bn_gamma = 1.0 + 0.1 * jax.random.normal(k[5], (C,), jnp.float32)
    bn_beta = 0.1 * jax.random.normal(k[6], (C,), jnp.float32)
    bn_mean = 0.1 * jax.random.normal(k[7], (C,), jnp.float32)
    bn_var = jnp.abs(jax.random.normal(k[8], (C,), jnp.float32)) + 0.5

    ref = mfa_ref(x_ful, x1, x2, conv_w, conv_b,
                  bn_gamma, bn_beta, bn_mean, bn_var)

    # Fast path: bf16 MXU operands (production default) — looser tolerance.
    out_bf16 = jax.block_until_ready(
        mfa_forward(x_ful, x1, x2, conv_w, conv_b,
                    bn_gamma, bn_beta, bn_mean, bn_var,
                    mxu_dtype=jnp.bfloat16))
    assert out_bf16.shape == ref.shape and out_bf16.dtype == ref.dtype
    err_bf16 = float(jnp.max(jnp.abs(out_bf16 - ref)))
    assert jnp.allclose(out_bf16, ref, atol=5e-2, rtol=5e-2), (
        f"bf16 path mismatch, max_err={err_bf16}")

    # f32 MXU path — tight check of the kernel math itself.
    out_f32 = jax.block_until_ready(
        mfa_forward(x_ful, x1, x2, conv_w, conv_b,
                    bn_gamma, bn_beta, bn_mean, bn_var,
                    mxu_dtype=jnp.float32))
    err_f32 = float(jnp.max(jnp.abs(out_f32 - ref)))
    assert jnp.allclose(out_f32, ref, atol=1e-3, rtol=1e-3), (
        f"f32 path mismatch, max_err={err_f32}")

    print("KERNEL_OK")
</pallas_src>

<mosaic_0001>
module attributes {stable_mosaic.version = 11 : i64} {
  func.func @_mfa_kernel(%arg0: i32, %arg1: memref<1x324x4xf32, #tpu.memory_space<vmem>>, %arg2: memref<1x324x4xf32, #tpu.memory_space<vmem>>, %arg3: memref<1x324x4xf32, #tpu.memory_space<vmem>>, %arg4: memref<3x3x8x4xbf16, #tpu.memory_space<vmem>>, %arg5: memref<1x4xf32, #tpu.memory_space<vmem>>, %arg6: memref<1x4xf32, #tpu.memory_space<vmem>>, %arg7: memref<1x288x4xf32, #tpu.memory_space<vmem>>) attributes {dimension_semantics = [#tpu.dimension_semantics<parallel>], iteration_bounds = array<i64: 2>, scalar_prefetch = 0 : i64, scratch_operands = 0 : i64, tpu.core_type = #tpu.core_type<tc>, window_params = [{transform_indices = @transform_0, window_bounds = array<i64: 1, 324, 4>}, {transform_indices = @transform_1, window_bounds = array<i64: 1, 324, 4>}, {transform_indices = @transform_2, window_bounds = array<i64: 1, 324, 4>}, {pipeline_mode = #tpu.pipeline_mode<synchronous>, transform_indices = @transform_3, window_bounds = array<i64: 3, 3, 8, 4>}, {pipeline_mode = #tpu.pipeline_mode<synchronous>, transform_indices = @transform_4, window_bounds = array<i64: 1, 4>}, {pipeline_mode = #tpu.pipeline_mode<synchronous>, transform_indices = @transform_5, window_bounds = array<i64: 1, 4>}, {transform_indices = @transform_6, window_bounds = array<i64: 1, 288, 4>}]} {
    %c0 = arith.constant 0 : index
    %c0_0 = arith.constant 0 : index
    %c0_1 = arith.constant 0 : index
    %0 = vector.load %arg1[%c0, %c0_0, %c0_1] : memref<1x324x4xf32, #tpu.memory_space<vmem>>, vector<1x324x4xf32>
    %1 = vector.shape_cast %0 : vector<1x324x4xf32> to vector<324x4xf32>
    %c0_2 = arith.constant 0 : index
    %c0_3 = arith.constant 0 : index
    %c0_4 = arith.constant 0 : index
    %2 = vector.load %arg2[%c0_2, %c0_3, %c0_4] : memref<1x324x4xf32, #tpu.memory_space<vmem>>, vector<1x324x4xf32>
    %3 = vector.shape_cast %2 : vector<1x324x4xf32> to vector<324x4xf32>
    %4 = arith.mulf %1, %3 : vector<324x4xf32>
    %c0_5 = arith.constant 0 : index
    %c0_6 = arith.constant 0 : index
    %c0_7 = arith.constant 0 : index
    %5 = vector.load %arg3[%c0_5, %c0_6, %c0_7] : memref<1x324x4xf32, #tpu.memory_space<vmem>>, vector<1x324x4xf32>
    %6 = vector.shape_cast %5 : vector<1x324x4xf32> to vector<324x4xf32>
    %7 = arith.mulf %1, %6 : vector<324x4xf32>
    %8 = tpu.concatenate %4, %7 in 1 : vector<324x4xf32>, vector<324x4xf32> -> vector<324x8xf32>
    %9 = arith.truncf %8 : vector<324x8xf32> to vector<324x8xbf16>
    %cst = arith.constant 0.000000e+00 : f32
    %10 = vector.broadcast %cst : f32 to vector<288x4xf32>
    %cst_8 = arith.constant 0.000000e+00 : f32
    %11 = vector.broadcast %cst_8 : f32 to vector<288x4xf32>
    %cst_9 = arith.constant 0.000000e+00 : f32
    %12 = vector.broadcast %cst_9 : f32 to vector<288x4xf32>
    %13 = vector.extract_strided_slice %9 {offsets = [0, 0], sizes = [288, 8], strides = [1, 1]} : vector<324x8xbf16> to vector<288x8xbf16>
    %c0_10 = arith.constant 0 : index
    %c0_11 = arith.constant 0 : index
    %c0_12 = arith.constant 0 : index
    %c0_13 = arith.constant 0 : index
    %14 = vector.load %arg4[%c0_10, %c0_11, %c0_12, %c0_13] : memref<3x3x8x4xbf16, #tpu.memory_space<vmem>>, vector<1x1x8x4xbf16>
    %15 = vector.shape_cast %14 : vector<1x1x8x4xbf16> to vector<8x4xbf16>
    %cst_14 = arith.constant dense<0.000000e+00> : vector<288x4xf32>
    %16 = tpu.matmul %13, %15, %cst_14 {dimension_numbers = #tpu.dot_dimension_numbers<[1], [0], [0], [1], [0, 0, 1, 1], [], []>} : vector<288x8xbf16>, vector<8x4xbf16>, vector<288x4xf32> -> vector<288x4xf32>
    %17 = arith.addf %10, %16 : vector<288x4xf32>
    %c0_15 = arith.constant 0 : index
    %c1 = arith.constant 1 : index
    %c0_16 = arith.constant 0 : index
    %c0_17 = arith.constant 0 : index
    %18 = vector.load %arg4[%c0_15, %c1, %c0_16, %c0_17] : memref<3x3x8x4xbf16, #tpu.memory_space<vmem>>, vector<1x1x8x4xbf16>
    %19 = vector.shape_cast %18 : vector<1x1x8x4xbf16> to vector<8x4xbf16>
    %cst_18 = arith.constant dense<0.000000e+00> : vector<288x4xf32>
    %20 = tpu.matmul %13, %19, %cst_18 {dimension_numbers = #tpu.dot_dimension_numbers<[1], [0], [0], [1], [0, 0, 1, 1], [], []>} : vector<288x8xbf16>, vector<8x4xbf16>, vector<288x4xf32> -> vector<288x4xf32>
    %21 = arith.addf %11, %20 : vector<288x4xf32>
    %c0_19 = arith.constant 0 : index
    %c2 = arith.constant 2 : index
    %c0_20 = arith.constant 0 : index
    %c0_21 = arith.constant 0 : index
    %22 = vector.load %arg4[%c0_19, %c2, %c0_20, %c0_21] : memref<3x3x8x4xbf16, #tpu.memory_space<vmem>>, vector<1x1x8x4xbf16>
    %23 = vector.shape_cast %22 : vector<1x1x8x4xbf16> to vector<8x4xbf16>
    %cst_22 = arith.constant dense<0.000000e+00> : vector<288x4xf32>
    %24 = tpu.matmul %13, %23, %cst_22 {dimension_numbers = #tpu.dot_dimension_numbers<[1], [0], [0], [1], [0, 0, 1, 1], [], []>} : vector<288x8xbf16>, vector<8x4xbf16>, vector<288x4xf32> -> vector<288x4xf32>
    %25 = arith.addf %12, %24 : vector<288x4xf32>
    %26 = vector.extract_strided_slice %9 {offsets = [18, 0], sizes = [288, 8], strides = [1, 1]} : vector<324x8xbf16> to vector<288x8xbf16>
    %c1_23 = arith.constant 1 : index
    %c0_24 = arith.constant 0 : index
    %c0_25 = arith.constant 0 : index
    %c0_26 = arith.constant 0 : index
    %27 = vector.load %arg4[%c1_23, %c0_24, %c0_25, %c0_26] : memref<3x3x8x4xbf16, #tpu.memory_space<vmem>>, vector<1x1x8x4xbf16>
    %28 = vector.shape_cast %27 : vector<1x1x8x4xbf16> to vector<8x4xbf16>
    %cst_27 = arith.constant dense<0.000000e+00> : vector<288x4xf32>
    %29 = tpu.matmul %26, %28, %cst_27 {dimension_numbers = #tpu.dot_dimension_numbers<[1], [0], [0], [1], [0, 0, 1, 1], [], []>} : vector<288x8xbf16>, vector<8x4xbf16>, vector<288x4xf32> -> vector<288x4xf32>
    %30 = arith.addf %17, %29 : vector<288x4xf32>
    %c1_28 = arith.constant 1 : index
    %c1_29 = arith.constant 1 : index
    %c0_30 = arith.constant 0 : index
    %c0_31 = arith.constant 0 : index
    %31 = vector.load %arg4[%c1_28, %c1_29, %c0_30, %c0_31] : memref<3x3x8x4xbf16, #tpu.memory_space<vmem>>, vector<1x1x8x4xbf16>
    %32 = vector.shape_cast %31 : vector<1x1x8x4xbf16> to vector<8x4xbf16>
    %cst_32 = arith.constant dense<0.000000e+00> : vector<288x4xf32>
    %33 = tpu.matmul %26, %32, %cst_32 {dimension_numbers = #tpu.dot_dimension_numbers<[1], [0], [0], [1], [0, 0, 1, 1], [], []>} : vector<288x8xbf16>, vector<8x4xbf16>, vector<288x4xf32> -> vector<288x4xf32>
    %34 = arith.addf %21, %33 : vector<288x4xf32>
    %c1_33 = arith.constant 1 : index
    %c2_34 = arith.constant 2 : index
    %c0_35 = arith.constant 0 : index
    %c0_36 = arith.constant 0 : index
    %35 = vector.load %arg4[%c1_33, %c2_34, %c0_35, %c0_36] : memref<3x3x8x4xbf16, #tpu.memory_space<vmem>>, vector<1x1x8x4xbf16>
    %36 = vector.shape_cast %35 : vector<1x1x8x4xbf16> to vector<8x4xbf16>
    %cst_37 = arith.constant dense<0.000000e+00> : vector<288x4xf32>
    %37 = tpu.matmul %26, %36, %cst_37 {dimension_numbers = #tpu.dot_dimension_numbers<[1], [0], [0], [1], [0, 0, 1, 1], [], []>} : vector<288x8xbf16>, vector<8x4xbf16>, vector<288x4xf32> -> vector<288x4xf32>
    %38 = arith.addf %25, %37 : vector<288x4xf32>
    %39 = vector.extract_strided_slice %9 {offsets = [36, 0], sizes = [288, 8], strides = [1, 1]} : vector<324x8xbf16> to vector<288x8xbf16>
    %c2_38 = arith.constant 2 : index
    %c0_39 = arith.constant 0 : index
    %c0_40 = arith.constant 0 : index
    %c0_41 = arith.constant 0 : index
    %40 = vector.load %arg4[%c2_38, %c0_39, %c0_40, %c0_41] : memref<3x3x8x4xbf16, #tpu.memory_space<vmem>>, vector<1x1x8x4xbf16>
    %41 = vector.shape_cast %40 : vector<1x1x8x4xbf16> to vector<8x4xbf16>
    %cst_42 = arith.constant dense<0.000000e+00> : vector<288x4xf32>
    %42 = tpu.matmul %39, %41, %cst_42 {dimension_numbers = #tpu.dot_dimension_numbers<[1], [0], [0], [1], [0, 0, 1, 1], [], []>} : vector<288x8xbf16>, vector<8x4xbf16>, vector<288x4xf32> -> vector<288x4xf32>
    %43 = arith.addf %30, %42 : vector<288x4xf32>
    %c2_43 = arith.constant 2 : index
    %c1_44 = arith.constant 1 : index
    %c0_45 = arith.constant 0 : index
    %c0_46 = arith.constant 0 : index
    %44 = vector.load %arg4[%c2_43, %c1_44, %c0_45, %c0_46] : memref<3x3x8x4xbf16, #tpu.memory_space<vmem>>, vector<1x1x8x4xbf16>
    %45 = vector.shape_cast %44 : vector<1x1x8x4xbf16> to vector<8x4xbf16>
    %cst_47 = arith.constant dense<0.000000e+00> : vector<288x4xf32>
    %46 = tpu.matmul %39, %45, %cst_47 {dimension_numbers = #tpu.dot_dimension_numbers<[1], [0], [0], [1], [0, 0, 1, 1], [], []>} : vector<288x8xbf16>, vector<8x4xbf16>, vector<288x4xf32> -> vector<288x4xf32>
    %47 = arith.addf %34, %46 : vector<288x4xf32>
    %c2_48 = arith.constant 2 : index
    %c2_49 = arith.constant 2 : index
    %c0_50 = arith.constant 0 : index
    %c0_51 = arith.constant 0 : index
    %48 = vector.load %arg4[%c2_48, %c2_49, %c0_50, %c0_51] : memref<3x3x8x4xbf16, #tpu.memory_space<vmem>>, vector<1x1x8x4xbf16>
    %49 = vector.shape_cast %48 : vector<1x1x8x4xbf16> to vector<8x4xbf16>
    %cst_52 = arith.constant dense<0.000000e+00> : vector<288x4xf32>
    %50 = tpu.matmul %39, %49, %cst_52 {dimension_numbers = #tpu.dot_dimension_numbers<[1], [0], [0], [1], [0, 0, 1, 1], [], []>} : vector<288x8xbf16>, vector<8x4xbf16>, vector<288x4xf32> -> vector<288x4xf32>
    %51 = arith.addf %38, %50 : vector<288x4xf32>
    %52 = vector.extract_strided_slice %47 {offsets = [1, 0], sizes = [287, 4], strides = [1, 1]} : vector<288x4xf32> to vector<287x4xf32>
    %cst_53 = arith.constant 0.000000e+00 : f32
    %53 = vector.broadcast %cst_53 : f32 to vector<1x4xf32>
    %54 = tpu.concatenate %52, %53 in 0 : vector<287x4xf32>, vector<1x4xf32> -> vector<288x4xf32>
    %55 = arith.addf %43, %54 : vector<288x4xf32>
    %56 = vector.extract_strided_slice %51 {offsets = [2, 0], sizes = [286, 4], strides = [1, 1]} : vector<288x4xf32> to vector<286x4xf32>
    %cst_54 = arith.constant 0.000000e+00 : f32
    %57 = vector.broadcast %cst_54 : f32 to vector<2x4xf32>
    %58 = tpu.concatenate %56, %57 in 0 : vector<286x4xf32>, vector<2x4xf32> -> vector<288x4xf32>
    %59 = arith.addf %55, %58 : vector<288x4xf32>
    %c0_55 = arith.constant 0 : index
    %c0_56 = arith.constant 0 : index
    %60 = vector.load %arg5[%c0_55, %c0_56] : memref<1x4xf32, #tpu.memory_space<vmem>>, vector<1x4xf32>
    %61 = vector.broadcast %60 : vector<1x4xf32> to vector<288x4xf32>
    %62 = arith.mulf %59, %61 : vector<288x4xf32>
    %c0_57 = arith.constant 0 : index
    %c0_58 = arith.constant 0 : index
    %63 = vector.load %arg6[%c0_57, %c0_58] : memref<1x4xf32, #tpu.memory_space<vmem>>, vector<1x4xf32>
    %64 = vector.broadcast %63 : vector<1x4xf32> to vector<288x4xf32>
    %65 = arith.addf %62, %64 : vector<288x4xf32>
    %66 = vector.extract_strided_slice %1 {offsets = [19, 0], sizes = [288, 4], strides = [1, 1]} : vector<324x4xf32> to vector<288x4xf32>
    %67 = arith.addf %66, %65 : vector<288x4xf32>
    %cst_59 = arith.constant 0.000000e+00 : f32
    %68 = vector.broadcast %cst_59 : f32 to vector<288x4xf32>
    %69 = arith.maximumf %67, %68 : vector<288x4xf32>
    %c0_60 = arith.constant 0 : index
    %c0_61 = arith.constant 0 : index
    %c0_62 = arith.constant 0 : index
    %70 = vector.load %arg7[%c0_60, %c0_61, %c0_62] : memref<1x288x4xf32, #tpu.memory_space<vmem>>, vector<1x288x4xf32>
    %71 = vector.shape_cast %70 : vector<1x288x4xf32> to vector<288x4xf32>
    %72 = vector.shape_cast %69 : vector<288x4xf32> to vector<1x288x4xf32>
    tpu.vector_store %arg7[%c0_60, %c0_61, %c0_62], %72 {strides = array<i32>} : memref<1x288x4xf32, #tpu.memory_space<vmem>>, vector<1x288x4xf32>,
    return
  }
  func.func @transform_0(%arg0: i32) -> (i32, i32, i32) {
    %c0_i32 = arith.constant 0 : i32
    %c0_i32_0 = arith.constant 0 : i32
    %c0_i32_1 = arith.constant 0 : i32
    return %arg0, %c0_i32, %c0_i32_0 : i32, i32, i32
  }
  func.func @transform_1(%arg0: i32) -> (i32, i32, i32) {
    %c0_i32 = arith.constant 0 : i32
    %c0_i32_0 = arith.constant 0 : i32
    %c0_i32_1 = arith.constant 0 : i32
    return %arg0, %c0_i32, %c0_i32_0 : i32, i32, i32
  }
  func.func @transform_2(%arg0: i32) -> (i32, i32, i32) {
    %c0_i32 = arith.constant 0 : i32
    %c0_i32_0 = arith.constant 0 : i32
    %c0_i32_1 = arith.constant 0 : i32
    return %arg0, %c0_i32, %c0_i32_0 : i32, i32, i32
  }
  func.func @transform_3(%arg0: i32) -> (i32, i32, i32, i32) {
    %c0_i32 = arith.constant 0 : i32
    %c0_i32_0 = arith.constant 0 : i32
    %c0_i32_1 = arith.constant 0 : i32
    %c0_i32_2 = arith.constant 0 : i32
    %c0_i32_3 = arith.constant 0 : i32
    return %c0_i32, %c0_i32_0, %c0_i32_1, %c0_i32_2 : i32, i32, i32, i32
  }
  func.func @transform_4(%arg0: i32) -> (i32, i32) {
    %c0_i32 = arith.constant 0 : i32
    %c0_i32_0 = arith.constant 0 : i32
    %c0_i32_1 = arith.constant 0 : i32
    return %c0_i32, %c0_i32_0 : i32, i32
  }
  func.func @transform_5(%arg0: i32) -> (i32, i32) {
    %c0_i32 = arith.constant 0 : i32
    %c0_i32_0 = arith.constant 0 : i32
    %c0_i32_1 = arith.constant 0 : i32
    return %c0_i32, %c0_i32_0 : i32, i32
  }
  func.func @transform_6(%arg0: i32) -> (i32, i32, i32) {
    %c0_i32 = arith.constant 0 : i32
    %c0_i32_0 = arith.constant 0 : i32
    %c0_i32_1 = arith.constant 0 : i32
    return %arg0, %c0_i32, %c0_i32_0 : i32, i32, i32
  }
}

</mosaic_0001>

<bundles_post_ra>
// kernel: tpu_custom_call.1
= control target key start
LH: loop header
LB: loop body
LE: loop exit
PB: predicated region body
PF: predicated region fallthrough
CT: control target
= control target key end

     0   :  { %s4631_s21 = smov 0   ;;  %s6369_s0 = inlined_call_operand.vmem [shape: f32[2,324,4], index: 0, kind: input, shape index: {}]   ;;  %s6370_s1 = inlined_call_operand.vmem [shape: f32[2,324,4], index: 1, kind: input, shape index: {}]   ;;  %s6371_s2 = inlined_call_operand.vmem [shape: f32[2,324,4], index: 2, kind: input, shape index: {}]   ;;  %s6372_s3 = inlined_call_operand.vmem [shape: bf16[3,3,8,4], index: 3, kind: input, shape index: {}]   ;;  %s6373_s4 = inlined_call_operand.vmem [shape: f32[1,4], index: 4, kind: input, shape index: {}]   ;;  %s6374_s5 = inlined_call_operand.vmem [shape: f32[1,4], index: 5, kind: input, shape index: {}]   ;;  %s6375_s6 = inlined_call_operand.vmem [shape: f32[2,288,4], index: 6, kind: output, shape index: {}]  }
   0x1 LB: > { %s3515_s22 = sadd.s32 4294967295, %s4593_s21   ;;  %p3519_p0 = scmp.ge.s32.totalorder %s4593_s21, 1  ;;  %s4593_s21 = sphi %s4631_s21, %s16_s21  }
   0x2   : > { %p232_p1 = scmp.lt.s32.totalorder %s4593_s21, 3 }
   0x4   : > { %p233_p2 = pnand %p3519_p0, %p232_p1 }
   0x5   : > { %p272_p3 = scmp.lt.s32.totalorder (!%p233_p2), %s3515_s22, 1  ;;  %v4655_v0 = vld [vmem:[%s6372_s3] sm:$0xf] (!%p233_p2)  ;;  %vm844_vm0 = vcmask (!%p233_p2), 1043456   ;;  %s4595_s11 = smov (!%p233_p2), 4   ;;  %vm662_vm1 = vcmask (!%p233_p2), 31744  }
   0x6   : > { %236 = sbr.rel (%p233_p2) target bundleno = 736 (0x2e0), region = 44  ;;  %4430 = vmatprep.subr.msk.bf16.mxu0 (!%p233_p2), %vm844_vm0, %v4655_v0  ;;  %v4672_v3 = vsel (!%p233_p2), %vm844_vm0, %v4655_v0, 0  ;;  %vm789_vm2 = vcmask (!%p233_p2), 64512   ;;  %vm751_vm3 = vcmask (!%p233_p2), 1046528   ;;  %vm1986_vm4 = vcmask (!%p233_p2), 1045504  }
   0x7   : > { %3908 = vmatpush3.bf16.msra.mxu0 (!%p233_p2), %v4672_v3  ;;  %vm3214_vm5 = vcmask (!%p233_p2), 1042432   ;;  %vm3397_vm6 = vcmask (!%p233_p2), 31747   ;;  %vm3434_vm7 = vcmask (!%p233_p2), 26624  }
   0xd   : > { %s6379_s22 = smov (!%p272_p3, %s3515_s22), 1 }
   0xe   : > { %s4439_s23 = smul.u32 328, %s6379_s22 }
  0x10   : > { %s4645_s26 = scalar_lea.vmem %s6369_s0, %s4439_s23  ;;  %s4650_s29 = scalar_lea.vmem %s6370_s1, %s4439_s23 }
  0x11   : > { %s4660_s10 = scalar_lea.vmem %s6371_s2, %s4439_s23  ;;  %v4663_v1 = vld [vmem:[%s4645_s26 + $0x20] sm:$0xff]  ;;  %v4666_v2 = vld [vmem:[%s4645_s26 + $0x28] sm:$0xff]  ;;  %v4690_v19 = vld [vmem:[%s4645_s26 + $0x30] sm:$0xff] }
  0x12   : > { %v420_v4 = vld [vmem:[%s4660_s10 + $0x20] sm:$0xff]  ;;  %v421_v5 = vld [vmem:[%s4660_s10 + $0x28] sm:$0xff]  ;;  %v4693_v20 = vld [vmem:[%s4645_s26 + $0x38] sm:$0xff] }
  0x13   : > { %v461_v6 = vmul.f32 %v420_v4, %v4663_v1  ;;  %v462_v7 = vmul.f32 %v421_v5, %v4666_v2  ;;  %v293_v8 = vld [vmem:[%s4645_s26] sm:$0xff]  ;;  %v294_v9 = vld [vmem:[%s4645_s26 + $0x8] sm:$0xff]  ;;  %v422_v21 = vld [vmem:[%s4660_s10 + $0x30] sm:$0xff] }
  0x14   : > { %v334_v10 = vld [vmem:[%s4650_s29] sm:$0xff]  ;;  %v335_v11 = vld [vmem:[%s4650_s29 + $0x8] sm:$0xff]  ;;  %v423_v22 = vld [vmem:[%s4660_s10 + $0x38] sm:$0xff]  ;;  %v463_v24 = vmul.f32 %v422_v21, %v4690_v19 }
  0x15   : > { %v416_v12 = vld [vmem:[%s4660_s10] sm:$0xff]  ;;  %v417_v13 = vld [vmem:[%s4660_s10 + $0x8] sm:$0xff]  ;;  %v4685_v14 = vmul.f32 %v334_v10, %v293_v8  ;;  %v4460_v15 = vpack.i.bf16 %v462_v7, %v461_v6  ;;  %v4687_v16 = vmul.f32 %v335_v11, %v294_v9  ;;  %v464_v25 = vmul.f32 %v423_v22, %v4693_v20  ;;  %v4701_v26 = vld [vmem:[%s4645_s26 + $0x10] sm:$0xff] }
  0x16   : > { %v457_v17 = vmul.f32 %v416_v12, %v293_v8  ;;  %v458_v18 = vmul.f32 %v417_v13, %v294_v9  ;;  %v4704_v27 = vld [vmem:[%s4645_s26 + $0x18] sm:$0xff]  ;;  %v418_v28 = vld [vmem:[%s4660_s10 + $0x10] sm:$0xff]  ;;  %v4712_v33 = vld [vmem:[%s4645_s26 + $0x40] sm:$0xff] }
  0x17   : > { %4461 = vrot.lane.b32.xlu1 %v4460_v15, %s4595_s11  ;;  %v419_v29 = vld [vmem:[%s4660_s10 + $0x18] sm:$0xff]  ;;  %v4465_v30 = vpack.i.bf16 %v464_v25, %v463_v24  ;;  %v459_v31 = vmul.f32 %v418_v28, %v4701_v26  ;;  %v4715_v34 = vld [vmem:[%s4645_s26 + $0x48] sm:$0xff]  ;;  %v424_v35 = vld [vmem:[%s4660_s10 + $0x40] sm:$0xff] }
  0x18   : > { %v4450_v23 = vpack.i.bf16 %v458_v18, %v457_v17  ;;  %v460_v32 = vmul.f32 %v419_v29, %v4704_v27  ;;  %v425_v36 = vld [vmem:[%s4660_s10 + $0x48] sm:$0xff]  ;;  %v465_v38 = vmul.f32 %v424_v35, %v4712_v33  ;;  %v4723_v40 = vld [vmem:[%s4645_s26 + $0x50] sm:$0xff]  ;;  %v4726_v41 = vld [vmem:[%s4645_s26 + $0x58] sm:$0xff] }
  0x19   : > { %v466_v39 = vmul.f32 %v425_v36, %v4715_v34  ;;  %v426_v42 = vld [vmem:[%s4660_s10 + $0x50] sm:$0xff]  ;;  %v427_v43 = vld [vmem:[%s4660_s10 + $0x58] sm:$0xff]  ;;  %v4734_v47 = vld [vmem:[%s4645_s26 + $0x60] sm:$0xff] }
  0x1a   : > { %4451 = vrot.lane.b32.xlu0 %v4450_v23, %s4595_s11  ;;  %v4455_v37 = vpack.i.bf16 %v460_v32, %v459_v31  ;;  %v467_v45 = vmul.f32 %v426_v42, %v4723_v40  ;;  %v468_v46 = vmul.f32 %v427_v43, %v4726_v41  ;;  %v4737_v48 = vld [vmem:[%s4645_s26 + $0x68] sm:$0xff]  ;;  %v428_v49 = vld [vmem:[%s4660_s10 + $0x60] sm:$0xff]  ;;  %v4744_v54 = vld [vmem:[%s4645_s26 + $0x70] sm:$0xff] }
  0x1b   : > { %4466 = vrot.lane.b32.xlu1 %v4465_v30, %s4595_s11  ;;  %v4470_v44 = vpack.i.bf16 %v466_v39, %v465_v38  ;;  %v429_v50 = vld [vmem:[%s4660_s10 + $0x68] sm:$0xff]  ;;  %v469_v52 = vmul.f32 %v428_v49, %v4734_v47  ;;  %v4747_v55 = vld [vmem:[%s4645_s26 + $0x78] sm:$0xff]  ;;  %v430_v56 = vld [vmem:[%s4660_s10 + $0x70] sm:$0xff] }
  0x1c   : > { %v4475_v51 = vpack.i.bf16 %v468_v46, %v467_v45  ;;  %v470_v53 = vmul.f32 %v429_v50, %v4737_v48  ;;  %v431_v57 = vld [vmem:[%s4660_s10 + $0x78] sm:$0xff]  ;;  %v471_v59 = vmul.f32 %v430_v56, %v4744_v54  ;;  %v4755_v60 = vld [vmem:[%s4645_s26 + $0x80] sm:$0xff]  ;;  %v4758_v61 = vld [vmem:[%s4645_s26 + $0x88] sm:$0xff] }
  0x1d   : > { %v472_v62 = vmul.f32 %v431_v57, %v4747_v55  ;;  %v432_v63 = vld [vmem:[%s4660_s10 + $0x80] sm:$0xff]  ;;  %v433_v4 = vld [vmem:[%s4660_s10 + $0x88] sm:$0xff]  ;;  %v4765_v6 = vld [vmem:[%s4645_s26 + $0x90] sm:$0xff] }
  0x1e   : > { %4456 = vrot.lane.b32.xlu0 %v4455_v37, %s4595_s11  ;;  %v4480_v58 = vpack.i.bf16 %v470_v53, %v469_v52  ;;  %v473_v5 = vmul.f32 %v432_v63, %v4755_v60  ;;  %v4768_v7 = vld [vmem:[%s4645_s26 + $0x98] sm:$0xff]  ;;  %v474_v9 = vmul.f32 %v433_v4, %v4758_v61  ;;  %v434_v10 = vld [vmem:[%s4660_s10 + $0x90] sm:$0xff]  ;;  %v4776_v13 = vld [vmem:[%s4645_s26 + $0xa0] sm:$0xff] }
  0x1f   : > { %4476 = vrot.lane.b32.xlu1 %v4475_v51, %s4595_s11  ;;  %v4485_v8 = vpack.i.bf16 %v472_v62, %v471_v59  ;;  %v435_v11 = vld [vmem:[%s4660_s10 + $0x98] sm:$0xff]  ;;  %v475_v12 = vmul.f32 %v434_v10, %v4765_v6  ;;  %v4779_v15 = vld [vmem:[%s4645_s26 + $0xa8] sm:$0xff]  ;;  %v436_v21 = vld [vmem:[%s4660_s10 + $0xa0] sm:$0xff] }
  0x20   : > { %v4490_v17 = vpack.i.bf16 %v474_v9, %v473_v5  ;;  %v476_v18 = vmul.f32 %v435_v11, %v4768_v7  ;;  %v437_v22 = vld [vmem:[%s4660_s10 + $0xa8] sm:$0xff]  ;;  %v477_v23 = vmul.f32 %v436_v21, %v4776_v13  ;;  %v4787_v24 = vld [vmem:[%s4645_s26 + $0xb0] sm:$0xff]  ;;  %v4790_v25 = vld [vmem:[%s4645_s26 + $0xb8] sm:$0xff] }
  0x21   : > { %v478_v29 = vmul.f32 %v437_v22, %v4779_v15  ;;  %v438_v30 = vld [vmem:[%s4660_s10 + $0xb0] sm:$0xff]  ;;  %v439_v31 = vld [vmem:[%s4660_s10 + $0xb8] sm:$0xff]  ;;  %v4798_v35 = vld [vmem:[%s4645_s26 + $0xc0] sm:$0xff] }
  0x22   : > { %4471 = vrot.lane.b32.xlu0 %v4470_v44, %s4595_s11  ;;  %v4495_v28 = vpack.i.bf16 %v476_v18, %v475_v12  ;;  %v479_v32 = vmul.f32 %v438_v30, %v4787_v24  ;;  %v4801_v36 = vld [vmem:[%s4645_s26 + $0xc8] sm:$0xff]  ;;  %v480_v38 = vmul.f32 %v439_v31, %v4790_v25  ;;  %v440_v39 = vld [vmem:[%s4660_s10 + $0xc0] sm:$0xff]  ;;  %v4809_v44 = vld [vmem:[%s4645_s26 + $0xd0] sm:$0xff] }
  0x23   : > { %4486 = vrot.lane.b32.xlu1 %v4485_v8, %s4595_s11  ;;  %v4500_v37 = vpack.i.bf16 %v478_v29, %v477_v23  ;;  %v441_v42 = vld [vmem:[%s4660_s10 + $0xc8] sm:$0xff]  ;;  %v481_v43 = vmul.f32 %v440_v39, %v4798_v35  ;;  %v4812_v45 = vld [vmem:[%s4645_s26 + $0xd8] sm:$0xff]  ;;  %v442_v50 = vld [vmem:[%s4660_s10 + $0xd0] sm:$0xff] }
  0x24   : > { %v4505_v46 = vpack.i.bf16 %v480_v38, %v479_v32  ;;  %v482_v49 = vmul.f32 %v441_v42, %v4801_v36  ;;  %v443_v51 = vld [vmem:[%s4660_s10 + $0xd8] sm:$0xff]  ;;  %v483_v52 = vmul.f32 %v442_v50, %v4809_v44  ;;  %v4820_v53 = vld [vmem:[%s4645_s26 + $0xe0] sm:$0xff]  ;;  %v4823_v56 = vld [vmem:[%s4645_s26 + $0xe8] sm:$0xff] }
  0x25   : > { %v444_v59 = vld [vmem:[%s4660_s10 + $0xe0] sm:$0xff]  ;;  %v445_v62 = vld [vmem:[%s4660_s10 + $0xe8] sm:$0xff]  ;;  %v4831_v4 = vld [vmem:[%s4645_s26 + $0xf0] sm:$0xff] }
  0x26   : > { %4481 = vrot.lane.b32.xlu0 %v4480_v58, %s4595_s11  ;;  %v4510_v57 = vpack.i.bf16 %v482_v49, %v481_v43  ;;  %v484_v58 = vmul.f32 %v443_v51, %v4812_v45  ;;  %v485_v63 = vmul.f32 %v444_v59, %v4820_v53  ;;  %v4834_v5 = vld [vmem:[%s4645_s26 + $0xf8] sm:$0xff]  ;;  %v486_v9 = vmul.f32 %v445_v62, %v4823_v56  ;;  %v446_v10 = vld [vmem:[%s4660_s10 + $0xf0] sm:$0xff]  ;;  %v4845_v18 = vld [vmem:[%s4645_s26 + $0x108] sm:$0xff] }
  0x27   : > { %4496 = vrot.lane.b32.xlu1 %v4495_v28, %s4595_s11  ;;  %v447_v11 = vld [vmem:[%s4660_s10 + $0xf8] sm:$0xff]  ;;  %v487_v12 = vmul.f32 %v446_v10, %v4831_v4  ;;  %v448_v23 = vld [vmem:[%s4660_s10 + $0x100] sm:$0xff]  ;;  %v449_v28 = vld [vmem:[%s4660_s10 + $0x108] sm:$0xff] }
  0x28   : > { %v4515_v8 = vpack.i.bf16 %v484_v58, %v483_v52  ;;  %v4520_v21 = vpack.i.bf16 %v486_v9, %v485_v63  ;;  %v488_v22 = vmul.f32 %v447_v11, %v4834_v5  ;;  %v4853_v30 = vld [vmem:[%s4645_s26 + $0x110] sm:$0xff]  ;;  %v4856_v31 = vld [vmem:[%s4645_s26 + $0x118] sm:$0xff]  ;;  %v4864_v43 = vld [vmem:[%s4645_s26 + $0x120] sm:$0xff] }
  0x29   : > { %v450_v38 = vld [vmem:[%s4660_s10 + $0x110] sm:$0xff]  ;;  %v451_v39 = vld [vmem:[%s4660_s10 + $0x118] sm:$0xff]  ;;  %v452_v51 = vld [vmem:[%s4660_s10 + $0x120] sm:$0xff] }
  0x2a   : > { %4491 = vrot.lane.b32.xlu0 %v4490_v17, %s4595_s11  ;;  %v4842_v17 = vld [vmem:[%s4645_s26 + $0x100] sm:$0xff]  ;;  %v4525_v32 = vpack.i.bf16 %v488_v22, %v487_v12  ;;  %v491_v42 = vmul.f32 %v450_v38, %v4853_v30  ;;  %v492_v50 = vmul.f32 %v451_v39, %v4856_v31  ;;  %v453_v52 = vld [vmem:[%s4660_s10 + $0x128] sm:$0xff]  ;;  %v4875_v58 = vld [vmem:[%s4645_s26 + $0x130] sm:$0xff] }
  0x2b   : > { %4506 = vrot.lane.b32.xlu1 %v4505_v46, %s4595_s11  ;;  %v489_v29 = vmul.f32 %v448_v23, %v4842_v17  ;;  %v4867_v46 = vld [vmem:[%s4645_s26 + $0x128] sm:$0xff]  ;;  %v332_v59 = vld [vmem:[%s4645_s26 + $0x138] sm:$0xff]  ;;  %v454_v9 = vld [vmem:[%s4660_s10 + $0x130] sm:$0xff] }
  0x2c   : > { %v4535_v62 = vpack.i.bf16 %v492_v50, %v491_v42  ;;  %v494_v63 = vmul.f32 %v453_v52, %v4867_v46  ;;  %v455_v10 = vld [vmem:[%s4660_s10 + $0x138] sm:$0xff]  ;;  %v495_v12 = vmul.f32 %v454_v9, %v4875_v58  ;;  %v333_v22 = vld [vmem:[%s4645_s26 + $0x140] sm:$0xf]  ;;  %v3526_v38 = vld [vmem:[%s6372_s3 + $0xc] sm:$0xf] }
  0x2d   : > { %v374_v23 = vld [vmem:[%s4650_s29 + $0x140] sm:$0xf]  ;;  %4429 = vmatprep.subr.msk.bf16.mxu1 %vm844_vm0, %v3526_v38  ;;  %v846_v42 = vsel %vm844_vm0, %v3526_v38, 0  ;;  %v337_v9 = vld [vmem:[%s4650_s29 + $0x18] sm:$0xff] }
  0x2e   : > { %4501 = vrot.lane.b32.xlu0 %v4500_v37, %s4595_s11  ;;  %v490_v37 = vmul.f32 %v449_v28, %v4845_v18  ;;  %3870 = vmatpush3.bf16.msra.mxu1 %v846_v42  ;;  %v338_v50 = vld [vmem:[%s4650_s29 + $0x20] sm:$0xff]  ;;  %v343_v42 = vld [vmem:[%s4650_s29 + $0x48] sm:$0xff] }
  0x2f   : > { %4516 = vrot.lane.b32.xlu1 %v4515_v8, %s4595_s11  ;;  %v373_v8 = vld [vmem:[%s4650_s29 + $0x138] sm:$0xff]  ;;  %4431 = vmatprep.subr.msk.bf16.mxu1 %vm844_vm0, %v4655_v0 }
  0x30   : > { %v4530_v49 = vpack.i.bf16 %v490_v37, %v489_v29  ;;  %v4883_v11 = vmul.f32 %v373_v8, %v332_v59  ;;  %v4889_v29 = vmul.f32 %v374_v23, %v333_v22  ;;  %v4895_v37 = vld [vmem:[%s6372_s3 + $0x14] sm:$0xf] }
  0x31   : > { %4434 = vmatprep.subr.msk.bf16.mxu0 %vm844_vm0, %v4895_v37  ;;  %v336_v8 = vld [vmem:[%s4650_s29 + $0x10] sm:$0xff] }
  0x32   : > { %4511 = vrot.lane.b32.xlu0 %v4510_v57, %s4595_s11  ;;  %v493_v57 = vmul.f32 %v452_v51, %v4864_v43  ;;  %v339_v51 = vld [vmem:[%s4650_s29 + $0x28] sm:$0xff]  ;;  %v377_v38 = vmul.f32 %v336_v8, %v4701_v26 }
  0x33   : > { %4526 = vrot.lane.b32.xlu1 %v4525_v32, %s4595_s11  ;;  %v456_v32 = vld [vmem:[%s4660_s10 + $0x140] sm:$0xf]  ;;  %v380_v52 = vmul.f32 %v339_v51, %v4666_v2 }
  0x34   : > { %v4540_v28 = vpack.i.bf16 %v494_v63, %v493_v57  ;;  %v379_v57 = vmul.f32 %v338_v50, %v4663_v1 }
  0x36   : > { %4521 = vrot.lane.b32.xlu0 %v4520_v21, %s4595_s11  ;;  %v496_v21 = vmul.f32 %v455_v10, %v332_v59  ;;  %v340_v59 = vld [vmem:[%s4650_s29 + $0x30] sm:$0xff] }
  0x37   : > { %4536 = vrot.lane.b32.xlu1 %v4535_v62, %s4595_s11  ;;  %v341_v62 = vld [vmem:[%s4650_s29 + $0x38] sm:$0xff] }
  0x38   : > { %v4545_v39 = vpack.i.bf16 %v496_v21, %v495_v12  ;;  %v382_v0 = vmul.f32 %v341_v62, %v4693_v20  ;;  %v381_v21 = vmul.f32 %v340_v59, %v4690_v19  ;;  %v342_v19 = vld [vmem:[%s4650_s29 + $0x40] sm:$0xff]  ;;  %v345_v59 = vld [vmem:[%s4650_s29 + $0x58] sm:$0xff] }
  0x39   : > { %v346_v62 = vld [vmem:[%s4650_s29 + $0x60] sm:$0xff] }
  0x3a   : > { %4531 = vrot.lane.b32.xlu0 %v4530_v49, %s4595_s11  ;;  %v497_v49 = vmul.f32 %v456_v32, %v333_v22  ;;  %v378_v32 = vmul.f32 %v337_v9, %v4704_v27 }
  0x3b   : > { %4546 = vrot.lane.b32.xlu1 %v4545_v39, %s4595_s11 }
  0x3e   : > { %4541 = vrot.lane.b32.xlu0 %v4540_v28, %s4595_s11 }
  0x42   : > { %619 = vrot.lane.b32.xlu0 %v497_v49, %s4595_s11  ;;  %s4440_s11 = smul.u32 288, %s6379_s22 }
  0x44   : > { %s5826_s13 = scalar_lea.vmem %s6375_s6, %s4440_s11 }
  0x89   : > { %v4462_v63 = vpop.permute.xlu1 %4461 }
  0x8a   : > { %v4464_v10 = vunpack.i.h.bf16 %v4462_v63  ;;  %v4463_v12 = vunpack.i.l.bf16 %v4462_v63 }
  0x8c   : > { %v4452_v22 = vpop.permute.xlu0 %4451  ;;  %v668_v2 = vsel %vm662_vm1, %v380_v52, %v4464_v10  ;;  %v667_v1 = vsel %vm662_vm1, %v379_v57, %v4463_v12  ;;  %v344_v57 = vld [vmem:[%s4650_s29 + $0x50] sm:$0xff]  ;;  %v383_v12 = vmul.f32 %v342_v19, %v4712_v33  ;;  %v387_v33 = vmul.f32 %v346_v62, %v4734_v47  ;;  %v4961_v47 = vld [vmem:[%s6372_s3 + $0x8] sm:$0xf] }
  0x8d   : > { %v4454_v23 = vunpack.i.h.bf16 %v4452_v22  ;;  %v4453_v28 = vunpack.i.l.bf16 %v4452_v22  ;;  %v4923_v39 = vpack.c.bf16 %v668_v2, %v667_v1  ;;  %v4467_v20 = vpop.permute.xlu1 %4466  ;;  %v386_v2 = vmul.f32 %v345_v59, %v4726_v41  ;;  %v347_v1 = vld [vmem:[%s4650_s29 + $0x68] sm:$0xff] }
  0x8e   : > { %v4469_v49 = vunpack.i.h.bf16 %v4467_v20  ;;  %v4468_v50 = vunpack.i.l.bf16 %v4467_v20  ;;  %v1624_v19 = vsel %vm844_vm0, %v4895_v37, 0  ;;  %v351_v59 = vld [vmem:[%s4650_s29 + $0x88] sm:$0xff] }
  0x8f   : > { %v663_v51 = vsel %vm662_vm1, %v4685_v14, %v4453_v28  ;;  %v664_v52 = vsel %vm662_vm1, %v4687_v16, %v4454_v23  ;;  %v384_v14 = vmul.f32 %v343_v42, %v4715_v34  ;;  %v753_v22 = vrot.slane %v4923_v39, 1 }
  0x90   : > { %v4457_v27 = vpop.permute.xlu0 %4456  ;;  %v4933_v26 = vpack.c.bf16 %v664_v52, %v663_v51  ;;  %v670_v63 = vsel %vm662_vm1, %v382_v0, %v4469_v49  ;;  %v669_v8 = vsel %vm662_vm1, %v381_v21, %v4468_v50  ;;  %v385_v0 = vmul.f32 %v344_v57, %v4723_v40  ;;  %v348_v21 = vld [vmem:[%s4650_s29 + $0x70] sm:$0xff]  ;;  %v349_v49 = vld [vmem:[%s4650_s29 + $0x78] sm:$0xff] }
  0x91   : > { %v4459_v9 = vunpack.i.h.bf16 %v4457_v27  ;;  %v4458_v10 = vunpack.i.l.bf16 %v4457_v27  ;;  %v4940_v16 = vpack.c.bf16 %v670_v63, %v669_v8  ;;  %v4477_v42 = vpop.permute.xlu1 %4476  ;;  %v389_v52 = vmul.f32 %v348_v21, %v4744_v54  ;;  %v350_v63 = vld [vmem:[%s4650_s29 + $0x80] sm:$0xff] }
  0x92   : > { %3909 = vmatprep.mubr.msk.bf16.mxu0 %vm789_vm2, %v4933_v26  ;;  %v4479_v51 = vunpack.i.h.bf16 %v4477_v42  ;;  %v390_v54 = vmul.f32 %v349_v49, %v4747_v55 }
  0x93   : > { %v666_v23 = vsel %vm662_vm1, %v378_v32, %v4459_v9  ;;  %v665_v34 = vsel %vm662_vm1, %v377_v38, %v4458_v10  ;;  %v755_v41 = vrot.slane %v4940_v16, 1  ;;  %v4478_v32 = vunpack.i.l.bf16 %v4477_v42  ;;  %v353_v42 = vld [vmem:[%s4650_s29 + $0x98] sm:$0xff] }
  0x94   : > { %v4952_v28 = vpack.c.bf16 %v666_v23, %v665_v34  ;;  %v4472_v20 = vpop.permute.xlu0 %4471  ;;  %v388_v38 = vmul.f32 %v347_v1, %v4737_v48  ;;  %v674_v48 = vsel %vm662_vm1, %v386_v2, %v4479_v51 }
  0x95   : > { %v4474_v40 = vunpack.i.h.bf16 %v4472_v20  ;;  %v4473_v50 = vunpack.i.l.bf16 %v4472_v20  ;;  %v4969_v57 = vsel %vm751_vm3, %v753_v22, %v755_v41  ;;  %v673_v9 = vsel %vm662_vm1, %v385_v0, %v4478_v32  ;;  %v4487_v1 = vpop.permute.xlu1 %4486  ;;  %v4994_v0 = vld [vmem:[%s6372_s3 + $0x10] sm:$0xf] }
  0x96   : > { %3910 = vmatmul.mubr.msk.bf16.vlgmr.msra.gmra.mrb[0].mxu0 %vm789_vm2, %v4952_v28  ;;  %v752_v37 = vrot.slane %v4952_v28, 1  ;;  %v4489_v23 = vunpack.i.h.bf16 %v4487_v1  ;;  %v4488_v34 = vunpack.i.l.bf16 %v4487_v1  ;;  %v391_v20 = vmul.f32 %v350_v63, %v4755_v60 }
  0x97   : > { %v672_v27 = vsel %vm662_vm1, %v384_v14, %v4474_v40  ;;  %v671_v62 = vsel %vm662_vm1, %v383_v12, %v4473_v50  ;;  %4022 = vmatpush3.bf16.msra.mxu0 %v1624_v19  ;;  %3913 = vmatprep.mubr.msk.bf16.mxu0 %vm789_vm2, %v4923_v39  ;;  %v4987_v12 = vpack.c.bf16 %v674_v48, %v673_v9  ;;  %v352_v19 = vld [vmem:[%s4650_s29 + $0x90] sm:$0xff] }
  0x98   : > { %v4979_v8 = vpack.c.bf16 %v672_v27, %v671_v62  ;;  %v4983_v10 = vsel %vm751_vm3, %v752_v37, %v753_v22  ;;  %v4482_v14 = vpop.permute.xlu0 %4481  ;;  %4435 = vmatprep.subr.msk.bf16.mxu0 %vm844_vm0, %v4961_v47  ;;  %v392_v22 = vmul.f32 %v351_v59, %v4758_v61  ;;  %v678_v32 = vsel %vm662_vm1, %v390_v54, %v4489_v23  ;;  %v355_v62 = vld [vmem:[%s4650_s29 + $0xa8] sm:$0xff] }
  0x99   : > { %3871 = vmatprep.mubr.msk.bf16.mxu1 %vm789_vm2, %v4983_v10  ;;  %v4484_v55 = vunpack.i.h.bf16 %v4482_v14  ;;  %v4483_v2 = vunpack.i.l.bf16 %v4482_v14  ;;  %v759_v61 = vrot.slane %v4987_v12, 1  ;;  %v677_v60 = vsel %vm662_vm1, %v389_v52, %v4488_v34 }
  0x9a   : > { %3872 = vmatmul.mubr.msk.bf16.vlgmr.msra.gmra.mrb[0].mxu1 %vm789_vm2, %v4969_v57  ;;  %v757_v21 = vrot.slane %v4979_v8, 1  ;;  %v394_v59 = vmul.f32 %v353_v42, %v4768_v7  ;;  %v393_v27 = vmul.f32 %v352_v19, %v4765_v6  ;;  %v5027_v48 = vpack.c.bf16 %v678_v32, %v677_v60 }
  0x9b   : > { %v676_v49 = vsel %vm662_vm1, %v388_v38, %v4484_v55  ;;  %v675_v40 = vsel %vm662_vm1, %v387_v33, %v4483_v2  ;;  %4212 = vmatpush3.bf16.msra.mxu1 %v4672_v3  ;;  %v4497_v38 = vpop.permute.xlu1 %4496  ;;  %v396_v1 = vmul.f32 %v355_v62, %v4779_v15 }
  0x9c   : > { %v5007_v50 = vpack.c.bf16 %v676_v49, %v675_v40  ;;  %v5010_v51 = vsel %vm751_vm3, %v755_v41, %v757_v21  ;;  %v4492_v37 = vpop.permute.xlu0 %4491  ;;  %4432 = vmatprep.subr.msk.bf16.mxu1 %vm844_vm0, %v4994_v0  ;;  %v354_v41 = vld [vmem:[%s4650_s29 + $0xa0] sm:$0xff]  ;;  %v5030_v54 = vsel %vm751_vm3, %v757_v21, %v759_v61  ;;  %v4499_v14 = vunpack.i.h.bf16 %v4497_v38 }
  0x9d   : > { %3875 = vmatprep.mubr.msk.bf16.mxu1 %vm789_vm2, %v5010_v51  ;;  %v4494_v33 = vunpack.i.h.bf16 %v4492_v37  ;;  %v4493_v3 = vunpack.i.l.bf16 %v4492_v37  ;;  %v4498_v55 = vunpack.i.l.bf16 %v4497_v38  ;;  %v395_v23 = vmul.f32 %v354_v41, %v4776_v13  ;;  %v359_v38 = vld [vmem:[%s4650_s29 + $0xc8] sm:$0xff] }
  0x9e   : > { %3914 = vmatmul.mubr.msk.bf16.gmra.mrb[4].mxu0 %vm789_vm2, %v4940_v16  ;;  %v761_v52 = vrot.slane %v5007_v50, 1  ;;  %v763_v42 = vrot.slane %v5027_v48, 1  ;;  %v682_v49 = vsel %vm662_vm1, %v394_v59, %v4499_v14 }
  0x9f   : > { %3917 = vmatprep.mubr.msk.bf16.mxu0 %vm789_vm2, %v4979_v8  ;;  %v680_v7 = vsel %vm662_vm1, %v392_v22, %v4494_v33  ;;  %v679_v6 = vsel %vm662_vm1, %v391_v20, %v4493_v3  ;;  %v4507_v21 = vpop.permute.xlu1 %4506  ;;  %v356_v22 = vld [vmem:[%s4650_s29 + $0xb0] sm:$0xff]  ;;  %v357_v20 = vld [vmem:[%s4650_s29 + $0xb8] sm:$0xff]  ;;  %v681_v15 = vsel %vm662_vm1, %v393_v27, %v4498_v55  ;;  %v358_v3 = vld [vmem:[%s4650_s29 + $0xc0] sm:$0xff] }
  0xa0   : > { %v5034_v63 = vpack.c.bf16 %v680_v7, %v679_v6  ;;  %v5037_v9 = vsel %vm751_vm3, %v759_v61, %v761_v52  ;;  %v4502_v2 = vpop.permute.xlu0 %4501  ;;  %v398_v37 = vmul.f32 %v357_v20, %v4790_v25  ;;  %v397_v33 = vmul.f32 %v356_v22, %v4787_v24  ;;  %v370_v22 = vld [vmem:[%s4650_s29 + $0x120] sm:$0xff] }
  0xa1   : > { %v4504_v34 = vunpack.i.h.bf16 %v4502_v2  ;;  %v4503_v19 = vunpack.i.l.bf16 %v4502_v2  ;;  %v5063_v59 = vpack.c.bf16 %v682_v49, %v681_v15  ;;  %v5066_v27 = vsel %vm751_vm3, %v761_v52, %v763_v42  ;;  %v361_v52 = vld [vmem:[%s4650_s29 + $0xd8] sm:$0xff]  ;;  %v362_v15 = vld [vmem:[%s4650_s29 + $0xe0] sm:$0xff] }
  0xa2   : > { %3876 = vmatmul.mubr.msk.bf16.gmra.mrb[4].mxu1 %vm789_vm2, %v5030_v54  ;;  %v765_v13 = vrot.slane %v5034_v63, 1  ;;  %v4509_v25 = vunpack.i.h.bf16 %v4507_v21  ;;  %v4508_v41 = vunpack.i.l.bf16 %v4507_v21  ;;  %v400_v6 = vmul.f32 %v359_v38, %v4801_v36 }
  0xa3   : > { %3879 = vmatprep.mubr.msk.bf16.mxu1 %vm789_vm2, %v5037_v9  ;;  %v684_v61 = vsel %vm662_vm1, %v396_v1, %v4504_v34  ;;  %v683_v32 = vsel %vm662_vm1, %v395_v23, %v4503_v19  ;;  %v5053_v60 = vpop.permute.xlu1 %4516  ;;  %v399_v14 = vmul.f32 %v358_v3, %v4798_v35  ;;  %v360_v23 = vld [vmem:[%s4650_s29 + $0xd0] sm:$0xff]  ;;  %v363_v34 = vld [vmem:[%s4650_s29 + $0xe8] sm:$0xff]  ;;  %v767_v21 = vrot.slane %v5063_v59, 1 }
  0xa4   : > { %v4512_v40 = vpop.permute.xlu0 %4511  ;;  %v5068_v24 = vpack.c.bf16 %v684_v61, %v683_v32  ;;  %v5071_v62 = vsel %vm751_vm3, %v763_v42, %v765_v13  ;;  %v371_v19 = vld [vmem:[%s4650_s29 + $0x128] sm:$0xff]  ;;  %v686_v36 = vsel %vm662_vm1, %v398_v37, %v4509_v25  ;;  %v685_v35 = vsel %vm662_vm1, %v397_v33, %v4508_v41  ;;  %v372_v37 = vld [vmem:[%s4650_s29 + $0x130] sm:$0xff] }
  0xa5   : > { %v4514_v55 = vunpack.i.h.bf16 %v4512_v40  ;;  %v4513_v2 = vunpack.i.l.bf16 %v4512_v40  ;;  %v402_v49 = vmul.f32 %v361_v52, %v4812_v45  ;;  %v401_v33 = vmul.f32 %v360_v23, %v4809_v44  ;;  %v365_v45 = vld [vmem:[%s4650_s29 + $0xf8] sm:$0xff] }
  0xa6   : > { %3918 = vmatmul.mubr.msk.bf16.gmra.mrb[8].mxu0 %vm789_vm2, %v4987_v12  ;;  %v769_v20 = vrot.slane %v5068_v24, 1  ;;  %v404_v3 = vmul.f32 %v363_v34, %v4823_v56  ;;  %v412_v38 = vmul.f32 %v371_v19, %v4867_v46  ;;  %v5106_v25 = vpack.c.bf16 %v686_v36, %v685_v35 }
  0xa7   : > { %3921 = vmatprep.mubr.msk.bf16.mxu0 %vm789_vm2, %v5007_v50  ;;  %v5077_v1 = vpop.permute.xlu1 %4526  ;;  %v688_v40 = vsel %vm662_vm1, %v400_v6, %v4514_v55  ;;  %v687_v61 = vsel %vm662_vm1, %v399_v14, %v4513_v2  ;;  %v411_v41 = vmul.f32 %v370_v22, %v4864_v43  ;;  %v5113_v6 = vsel %vm751_vm3, %v765_v13, %v767_v21  ;;  %v367_v22 = vld [vmem:[%s4650_s29 + $0x108] sm:$0xff] }
  0xa8   : > { %v5073_v7 = vpop.permute.xlu0 %4521  ;;  %v4519_v44 = vunpack.i.h.bf16 %v5053_v60  ;;  %v4518_v56 = vunpack.i.l.bf16 %v5053_v60  ;;  %v403_v46 = vmul.f32 %v362_v15, %v4820_v53  ;;  %v5118_v14 = vpack.c.bf16 %v688_v40, %v687_v61 }
  0xa9   : > { %v5121_v55 = vsel %vm751_vm3, %v767_v21, %v769_v20  ;;  %v413_v2 = vmul.f32 %v372_v37, %v4875_v58  ;;  %v4524_v52 = vunpack.i.h.bf16 %v5073_v7  ;;  %v4523_v13 = vunpack.i.l.bf16 %v5073_v7  ;;  %v364_v21 = vld [vmem:[%s4650_s29 + $0xf0] sm:$0xff] }
  0xaa   : > { %3880 = vmatmul.mubr.msk.bf16.gmra.mrb[8].mxu1 %vm789_vm2, %v5066_v27  ;;  %v406_v60 = vmul.f32 %v365_v45, %v4834_v5  ;;  %v771_v53 = vrot.slane %v5106_v25, 1  ;;  %v690_v58 = vsel %vm662_vm1, %v402_v49, %v4519_v44  ;;  %v689_v7 = vsel %vm662_vm1, %v401_v33, %v4518_v56 }
  0xab   : > { %3883 = vmatprep.mubr.msk.bf16.mxu1 %vm789_vm2, %v5071_v62  ;;  %v5098_v32 = vpop.permute.xlu1 %4536  ;;  %v773_v40 = vrot.slane %v5118_v14, 1  ;;  %v691_v49 = vsel %vm662_vm1, %v403_v46, %v4523_v13  ;;  %v408_v56 = vmul.f32 %v367_v22, %v4845_v18  ;;  %v4528_v13 = vunpack.i.l.bf16 %v5077_v1  ;;  %v369_v22 = vld [vmem:[%s4650_s29 + $0x118] sm:$0xff] }
  0xac   : > { %v5092_v42 = vpop.permute.xlu0 %4531 }
  0xad   : > { %v5165_v18 = vsel %vm751_vm3, %v771_v53, %v773_v40 }
  0xae   : > { %3922 = vmatmul.mubr.msk.bf16.gmra.mrb[12].mxu0 %vm789_vm2, %v5027_v48 }
  0xaf   : > { %3925 = vmatprep.mubr.msk.bf16.mxu0 %vm789_vm2, %v5034_v63  ;;  %v4547_v19 = vpop.permute.xlu1 %4546 }
  0xb0   : > { %v4542_v43 = vpop.permute.xlu0 %4541  ;;  %v4549_v36 = vunpack.i.h.bf16 %v4547_v19  ;;  %v4548_v35 = vunpack.i.l.bf16 %v4547_v19  ;;  %v692_v19 = vsel %vm662_vm1, %v404_v3, %v4524_v52  ;;  %v5158_v3 = vsel %vm751_vm3, %v769_v20, %v771_v53 }
  0xb1   : > { %v4544_v23 = vunpack.i.h.bf16 %v4542_v43  ;;  %v4543_v34 = vunpack.i.l.bf16 %v4542_v43  ;;  %v5162_v52 = vpack.c.bf16 %v692_v19, %v691_v49  ;;  %v4533_v20 = vunpack.i.l.bf16 %v5092_v42 }
  0xb2   : > { %3884 = vmatmul.mubr.msk.bf16.gmra.mrb[12].mxu1 %vm789_vm2, %v5113_v6  ;;  %v702_v37 = vsel %vm662_vm1, %v4883_v11, %v4549_v36  ;;  %v701_v45 = vsel %vm662_vm1, %v413_v2, %v4548_v35  ;;  %v5153_v11 = vpack.c.bf16 %v690_v58, %v689_v7  ;;  %v4534_v36 = vunpack.i.h.bf16 %v5092_v42  ;;  %v368_v58 = vld [vmem:[%s4650_s29 + $0x110] sm:$0xff] }
  0xb3   : > { %3887 = vmatprep.mubr.msk.bf16.mxu1 %vm789_vm2, %v5121_v55  ;;  %v700_v15 = vsel %vm662_vm1, %v412_v38, %v4544_v23  ;;  %v699_v5 = vsel %vm662_vm1, %v411_v41, %v4543_v34  ;;  %v723_v44 = vpack.c.bf16 %v702_v37, %v701_v45  ;;  %v405_v38 = vmul.f32 %v364_v21, %v4831_v4  ;;  %v366_v41 = vld [vmem:[%s4650_s29 + $0x100] sm:$0xff]  ;;  %v5200_v45 = vld [vmem:[%s6372_s3 + $0x18] sm:$0xf] }
  0xb4   : > { %v5139_v61 = vpack.c.bf16 %v700_v15, %v699_v5  ;;  %v620_v43 = vpop.permute.xlu0 %619  ;;  %v407_v34 = vmul.f32 %v366_v41, %v4842_v17  ;;  %v1804_v17 = vsel %vm844_vm0, %v4961_v47, 0  ;;  %v775_v42 = vrot.slane %v5153_v11, 1 }
  0xb5   : > { %v703_v33 = vsel %vm662_vm1, %v4889_v29, %v620_v43  ;;  %v4529_v29 = vunpack.i.h.bf16 %v5077_v1  ;;  %v787_v46 = vrot.slane %v723_v44, 1  ;;  %v2020_v53 = vrot.slane %v723_v44, 2 }
  0xb6   : > { %3926 = vmatmul.mubr.msk.bf16.gmra.mrb[16].mxu0 %vm789_vm2, %v5063_v59  ;;  %v724_v2 = vpack.c.bf16 %v703_v33, %v703_v33  ;;  %v785_v4 = vrot.slane %v5139_v61, 1  ;;  %v2018_v21 = vrot.slane %v5139_v61, 2  ;;  %v693_v7 = vsel %vm662_vm1, %v405_v38, %v4528_v13 }
  0xb7   : > { %4023 = vmatprep.mubr.msk.bf16.mxu0 %vm789_vm2, %v4983_v10  ;;  %v694_v1 = vsel %vm662_vm1, %v406_v60, %v4529_v29  ;;  %v777_v15 = vrot.slane %v5162_v52, 1  ;;  %v696_v47 = vsel %vm662_vm1, %v408_v56, %v4534_v36  ;;  %v695_v60 = vsel %vm662_vm1, %v407_v34, %v4533_v20  ;;  %v3524_v36 = vld [vmem:[%s6372_s3 + $0x4] sm:$0xf]  ;;  %v3656_v20 = vld [vmem:[%s6372_s3 + $0x1c] sm:$0xf] }
  0xb8   : > { %v2022_v23 = vrot.slane %v724_v2, 2  ;;  %v5172_v35 = vsel %vm751_vm3, %v785_v4, %v787_v46  ;;  %v5190_v5 = vsel %vm1986_vm4, %v2018_v21, %v2020_v53  ;;  %v410_v43 = vmul.f32 %v369_v22, %v4856_v31 }
  0xb9   : > { %v409_v19 = vmul.f32 %v368_v58, %v4853_v30  ;;  %v5208_v49 = vpack.c.bf16 %v694_v1, %v693_v7  ;;  %v5211_v44 = vsel %vm751_vm3, %v773_v40, %v775_v42  ;;  %v5213_v33 = vpack.c.bf16 %v696_v47, %v695_v60 }
  0xba   : > { %3888 = vmatmul.mubr.msk.bf16.gmra.mrb[16].mxu1 %vm789_vm2, %v5158_v3  ;;  %v5193_v37 = vsel %vm1986_vm4, %v2020_v53, %v2022_v23  ;;  %v5216_v38 = vsel %vm751_vm3, %v775_v42, %v777_v15  ;;  %v4539_v31 = vunpack.i.h.bf16 %v5098_v32  ;;  %v4538_v41 = vunpack.i.l.bf16 %v5098_v32  ;;  %v3675_v53 = vld [vmem:[%s6372_s3 + $0x20] sm:$0xf] }
  0xbb   : > { %3891 = vmatprep.mubr.msk.bf16.mxu1 %vm789_vm2, %v5165_v18  ;;  %v779_v30 = vrot.slane %v5208_v49, 1  ;;  %v781_v2 = vrot.slane %v5213_v33, 1  ;;  %v2006_v42 = vrot.slane %v5118_v14, 2  ;;  %v2012_v60 = vrot.slane %v5208_v49, 2 }
  0xbc   : > { %v698_v40 = vsel %vm662_vm1, %v410_v43, %v4539_v31  ;;  %v697_v56 = vsel %vm662_vm1, %v409_v19, %v4538_v41 }
  0xbd   : > { %v5234_v32 = vpack.c.bf16 %v698_v40, %v697_v56  ;;  %v5237_v29 = vsel %vm751_vm3, %v777_v15, %v779_v30  ;;  %v5240_v46 = vsel %vm751_vm3, %v779_v30, %v781_v2 }
  0xbe   : > { %4024 = vmatmul.mubr.msk.bf16.vlgmr.msra.gmra.mrb[20].mxu0 %vm789_vm2, %v4969_v57 }
  0xbf   : > { %4060 = vmatpush3.bf16.msra.mxu0 %v1804_v17  ;;  %4027 = vmatprep.mubr.msk.bf16.mxu0 %vm789_vm2, %v5010_v51  ;;  %v783_v13 = vrot.slane %v5234_v32, 1  ;;  %v2002_v17 = vrot.slane %v5068_v24, 2  ;;  %v2016_v31 = vrot.slane %v5234_v32, 2 }
  0xc0   : > { %4436 = vmatprep.subr.msk.bf16.mxu0 %vm844_vm0, %v5200_v45 }
  0xc1   : > { %v5252_v23 = vsel %vm751_vm3, %v781_v2, %v783_v13  ;;  %v5255_v34 = vsel %vm751_vm3, %v783_v13, %v785_v4  ;;  %v1262_v4 = vsel %vm844_vm0, %v4994_v0, 0  ;;  %v1442_v0 = vsel %vm844_vm0, %v3524_v36, 0 }
  0xc2   : > { %3892 = vmatmul.mubr.msk.bf16.gmra.mrb[20].mxu1 %vm789_vm2, %v5211_v44 }
  0xc3   : > { %3895 = vmatprep.mubr.msk.bf16.mxu1 %vm789_vm2, %v5216_v38 }
  0xc6   : > { %4028 = vmatmul.mubr.msk.bf16.gmra.mrb[24].mxu0 %vm789_vm2, %v5030_v54 }
  0xc7   : > { %4031 = vmatprep.mubr.msk.bf16.mxu0 %vm789_vm2, %v5037_v9 }
  0xca   : > { %3896 = vmatmul.mubr.msk.bf16.gmra.mrb[24].mxu1 %vm789_vm2, %v5237_v29 }
  0xcb   : > { %3899 = vmatprep.mubr.msk.bf16.mxu1 %vm789_vm2, %v5240_v46 }
  0xce   : > { %4032 = vmatmul.mubr.msk.bf16.gmra.mrb[28].mxu0 %vm789_vm2, %v5066_v27 }
  0xcf   : > { %4035 = vmatprep.mubr.msk.bf16.mxu0 %vm789_vm2, %v5071_v62 }
  0xd2   : > { %3900 = vmatmul.mubr.msk.bf16.gmra.mrb[28].mxu1 %vm789_vm2, %v5252_v23 }
  0xd3   : > { %3903 = vmatprep.mubr.msk.bf16.mxu1 %vm789_vm2, %v5255_v34 }
  0xd6   : > { %4036 = vmatmul.mubr.msk.bf16.gmra.mrb[32].mxu0 %vm789_vm2, %v5113_v6 }
  0xd7   : > { %4039 = vmatprep.mubr.msk.bf16.mxu0 %vm789_vm2, %v5121_v55 }
  0xda   : > { %3904 = vmatmul.mubr.msk.bf16.gmra.mrb[32].mxu1 %vm789_vm2, %v5172_v35 }
  0xdb   : > { %3929 = vmatprep.mubr.msk.bf16.mxu1 %vm789_vm2, %v5068_v24 }
  0xde   : > { %4040 = vmatmul.mubr.msk.bf16.gmra.mrb[36].mxu0 %vm789_vm2, %v5158_v3 }
  0xdf   : > { %4043 = vmatprep.mubr.msk.bf16.mxu0 %vm789_vm2, %v5165_v18 }
  0xe2   : > { %3930 = vmatmul.mubr.msk.bf16.vlgmr.msra.gmra.mrb[20].mxu1 %vm789_vm2, %v5106_v25 }
  0xe3   : > { %3933 = vmatprep.mubr.msk.bf16.mxu1 %vm789_vm2, %v5118_v14  ;;  %3946 = vmatpush3.bf16.msra.mxu1 %v1262_v4 }
  0xe4   : > { %4433 = vmatprep.subr.msk.bf16.mxu1 %vm844_vm0, %v3524_v36 }
  0xe6   : > { %4044 = vmatmul.mubr.msk.bf16.gmra.mrb[40].mxu0 %vm789_vm2, %v5211_v44 }
  0xe7   : > { %4047 = vmatprep.mubr.msk.bf16.mxu0 %vm789_vm2, %v5216_v38 }
  0xea   : > { %3934 = vmatmul.mubr.msk.bf16.gmra.mrb[24].mxu1 %vm789_vm2, %v5153_v11 }
  0xeb   : > { %3937 = vmatprep.mubr.msk.bf16.mxu1 %vm789_vm2, %v5162_v52 }
  0xee   : > { %4048 = vmatmul.mubr.msk.bf16.gmra.mrb[44].mxu0 %vm789_vm2, %v5237_v29 }
  0xef   : > { %4051 = vmatprep.mubr.msk.bf16.mxu0 %vm789_vm2, %v5240_v46 }
  0xf2   : > { %3938 = vmatmul.mubr.msk.bf16.gmra.mrb[28].mxu1 %vm789_vm2, %v5208_v49 }
  0xf3   : > { %3941 = vmatprep.mubr.msk.bf16.mxu1 %vm789_vm2, %v5213_v33 }
  0xf6   : > { %4052 = vmatmul.mubr.msk.bf16.gmra.mrb[48].mxu0 %vm789_vm2, %v5252_v23 }
  0xf7   : > { %4055 = vmatprep.mubr.msk.bf16.mxu0 %vm789_vm2, %v5255_v34 }
  0xfa   : > { %3942 = vmatmul.mubr.msk.bf16.gmra.mrb[32].mxu1 %vm789_vm2, %v5234_v32 }
  0xfb   : > { %3947 = vmatprep.mubr.msk.bf16.mxu1 %vm789_vm2, %v4983_v10  ;;  %v2079_v10 = vsel %vm844_vm0, %v5200_v45, 0 }
  0xfe   : > { %4056 = vmatmul.mubr.msk.bf16.gmra.mrb[52].mxu0 %vm789_vm2, %v5172_v35 }
  0xff   : > { %4061 = vmatprep.mubr.msk.bf16.mxu0 %vm789_vm2, %v4933_v26 }
 0x102   : > { %3948 = vmatmul.mubr.msk.bf16.vlgmr.msra.gmra.mrb[36].mxu1 %vm789_vm2, %v4969_v57  ;;  %v1987_v57 = vrot.slane %v4923_v39, 2 }
 0x103   : > { %3951 = vmatprep.mubr.msk.bf16.mxu1 %vm789_vm2, %v5010_v51  ;;  %3984 = vmatpush3.bf16.msra.mxu1 %v1442_v0  ;;  %v1988_v51 = vrot.slane %v4940_v16, 2 }
 0x104   : > { %4437 = vmatprep.subr.msk.bf16.mxu1 %vm844_vm0, %v3656_v20 }
 0x106   : > { %4062 = vmatmul.mubr.msk.bf16.vlgmr.msra.gmra.mrb[20].mxu0 %vm789_vm2, %v4952_v28 }
 0x107   : > { %4098 = vmatpush3.bf16.msra.mxu0 %v2079_v10  ;;  %4065 = vmatprep.mubr.msk.bf16.mxu0 %vm789_vm2, %v4923_v39 }
 0x108   : > { %4438 = vmatprep.subr.msk.bf16.mxu0 %vm844_vm0, %v3675_v53 }
 0x10a   : > { %3952 = vmatmul.mubr.msk.bf16.gmra.mrb[40].mxu1 %vm789_vm2, %v5030_v54  ;;  %v5395_v54 = vsel %vm1986_vm4, %v1987_v57, %v1988_v51 }
 0x10b   : > { %3955 = vmatprep.mubr.msk.bf16.mxu1 %vm789_vm2, %v5037_v9  ;;  %v2297_v9 = vsel %vm844_vm0, %v3656_v20, 0 }
 0x10e   : > { %4066 = vmatmul.mubr.msk.bf16.gmra.mrb[24].mxu0 %vm789_vm2, %v4940_v16 }
 0x10f   : > { %4069 = vmatprep.mubr.msk.bf16.mxu0 %vm789_vm2, %v4979_v8 }
 0x112   : > { %3956 = vmatmul.mubr.msk.bf16.gmra.mrb[44].mxu1 %vm789_vm2, %v5066_v27  ;;  %v1990_v27 = vrot.slane %v4979_v8, 2 }
 0x113   : > { %3959 = vmatprep.mubr.msk.bf16.mxu1 %vm789_vm2, %v5071_v62  ;;  %v1992_v62 = vrot.slane %v4987_v12, 2 }
 0x116   : > { %4070 = vmatmul.mubr.msk.bf16.gmra.mrb[28].mxu0 %vm789_vm2, %v4987_v12 }
 0x117   : > { %4073 = vmatprep.mubr.msk.bf16.mxu0 %vm789_vm2, %v5007_v50 }
 0x11a   : > { %3960 = vmatmul.mubr.msk.bf16.gmra.mrb[48].mxu1 %vm789_vm2, %v5113_v6  ;;  %v5408_v6 = vsel %vm1986_vm4, %v1988_v51, %v1990_v27 }
 0x11b   : > { %3963 = vmatprep.mubr.msk.bf16.mxu1 %vm789_vm2, %v5121_v55  ;;  %v5413_v55 = vsel %vm1986_vm4, %v1990_v27, %v1992_v62 }
 0x11e   : > { %4074 = vmatmul.mubr.msk.bf16.gmra.mrb[32].mxu0 %vm789_vm2, %v5027_v48 }
 0x11f   : > { %4077 = vmatprep.mubr.msk.bf16.mxu0 %vm789_vm2, %v5034_v63 }
 0x122   : > { %3964 = vmatmul.mubr.msk.bf16.gmra.mrb[52].mxu1 %vm789_vm2, %v5158_v3 }
 0x123   : > { %3967 = vmatprep.mubr.msk.bf16.mxu1 %vm789_vm2, %v5165_v18 }
 0x126   : > { %4078 = vmatmul.mubr.msk.bf16.gmra.mrb[36].mxu0 %vm789_vm2, %v5063_v59 }
 0x127   : > { %4081 = vmatprep.mubr.msk.bf16.mxu0 %vm789_vm2, %v5068_v24 }
 0x12a   : > { %3968 = vmatmul.mubr.msk.bf16.gmra.mrb[56].mxu1 %vm789_vm2, %v5211_v44 }
 0x12b   : > { %3971 = vmatprep.mubr.msk.bf16.mxu1 %vm789_vm2, %v5216_v38 }
 0x12e   : > { %4082 = vmatmul.mubr.msk.bf16.gmra.mrb[40].mxu0 %vm789_vm2, %v5106_v25 }
 0x12f   : > { %4085 = vmatprep.mubr.msk.bf16.mxu0 %vm789_vm2, %v5118_v14 }
 0x132   : > { %3972 = vmatmul.mubr.msk.bf16.gmra.mrb[60].mxu1 %vm789_vm2, %v5237_v29  ;;  %v2019_v29 = vsel %vm1986_vm4, %v2016_v31, %v2018_v21 }
 0x133   : > { %3975 = vmatprep.mubr.msk.bf16.mxu1 %vm789_vm2, %v5240_v46 }
 0x136   : > { %4086 = vmatmul.mubr.msk.bf16.gmra.mrb[44].mxu0 %vm789_vm2, %v5153_v11 }
 0x137   : > { %4089 = vmatprep.mubr.msk.bf16.mxu0 %vm789_vm2, %v5162_v52 }
 0x13a   : > { %3976 = vmatmul.mubr.msk.bf16.gmra.mrb[64].mxu1 %vm789_vm2, %v5252_v23 }
 0x13b   : > { %3979 = vmatprep.mubr.msk.bf16.mxu1 %vm789_vm2, %v5255_v34 }
 0x13e   : > { %4090 = vmatmul.mubr.msk.bf16.gmra.mrb[48].mxu0 %vm789_vm2, %v5208_v49 }
 0x13f   : > { %4093 = vmatprep.mubr.msk.bf16.mxu0 %vm789_vm2, %v5213_v33 }
 0x142   : > { %3980 = vmatmul.mubr.msk.bf16.gmra.mrb[68].mxu1 %vm789_vm2, %v5172_v35  ;;  %v1998_v35 = vrot.slane %v5034_v63, 2 }
 0x143   : > { %3985 = vmatprep.mubr.msk.bf16.mxu1 %vm789_vm2, %v4933_v26  ;;  %v2515_v26 = vsel %vm844_vm0, %v3675_v53, 0 }
 0x146   : > { %4094 = vmatmul.mubr.msk.bf16.gmra.mrb[52].mxu0 %vm789_vm2, %v5234_v32 }
 0x147   : > { %4099 = vmatprep.mubr.msk.bf16.mxu0 %vm789_vm2, %v5395_v54 }
 0x14a   : > { %3986 = vmatmul.mubr.msk.bf16.vlgmr.msra.gmra.mrb[36].mxu1 %vm789_vm2, %v4952_v28  ;;  %v1994_v28 = vrot.slane %v5007_v50, 2 }
 0x14b   : > { %3989 = vmatprep.mubr.msk.bf16.mxu1 %vm789_vm2, %v4923_v39  ;;  %4136 = vmatpush3.bf16.msra.mxu1 %v2297_v9  ;;  %v1996_v39 = vrot.slane %v5027_v48, 2 }
 0x14c   : > { %v5424_v3 = vsel %vm1986_vm4, %v1992_v62, %v1994_v28 }
 0x14d   : > { %v5429_v18 = vsel %vm1986_vm4, %v1994_v28, %v1996_v39 }
 0x14e   : > { %4100 = vmatmul.mubr.msk.bf16.vlgmr.msra.gmra.mrb[0].mxu0 %vm789_vm2, %v5408_v6 }
 0x14f   : > { %4174 = vmatpush3.bf16.msra.mxu0 %v2515_v26  ;;  %4103 = vmatprep.mubr.msk.bf16.mxu0 %vm789_vm2, %v5413_v55 }
 0x152   : > { %3990 = vmatmul.mubr.msk.bf16.gmra.mrb[40].mxu1 %vm789_vm2, %v4940_v16  ;;  %v2000_v16 = vrot.slane %v5063_v59, 2 }
 0x153   : > { %3993 = vmatprep.mubr.msk.bf16.mxu1 %vm789_vm2, %v4979_v8  ;;  %v5440_v8 = vsel %vm1986_vm4, %v1996_v39, %v1998_v35 }
 0x154   : > { %v5445_v22 = vsel %vm1986_vm4, %v1998_v35, %v2000_v16 }
 0x156   : > { %4104 = vmatmul.mubr.msk.bf16.gmra.mrb[4].mxu0 %vm789_vm2, %v5424_v3 }
 0x157   : > { %4107 = vmatprep.mubr.msk.bf16.mxu0 %vm789_vm2, %v5429_v18 }
 0x15a   : > { %3994 = vmatmul.mubr.msk.bf16.gmra.mrb[44].mxu1 %vm789_vm2, %v4987_v12  ;;  %v2004_v12 = vrot.slane %v5106_v25, 2 }
 0x15b   : > { %3997 = vmatprep.mubr.msk.bf16.mxu1 %vm789_vm2, %v5007_v50  ;;  %v5456_v50 = vsel %vm1986_vm4, %v2000_v16, %v2002_v17 }
 0x15c   : > { %v5461_v1 = vsel %vm1986_vm4, %v2002_v17, %v2004_v12  ;;  %v5474_v58 = vsel %vm1986_vm4, %v2004_v12, %v2006_v42 }
 0x15e   : > { %4108 = vmatmul.mubr.msk.bf16.gmra.mrb[8].mxu0 %vm789_vm2, %v5440_v8 }
 0x15f   : > { %4111 = vmatprep.mubr.msk.bf16.mxu0 %vm789_vm2, %v5445_v22 }
 0x162   : > { %3998 = vmatmul.mubr.msk.bf16.gmra.mrb[48].mxu1 %vm789_vm2, %v5027_v48  ;;  %v2008_v48 = vrot.slane %v5153_v11, 2 }
 0x163   : > { %4001 = vmatprep.mubr.msk.bf16.mxu1 %vm789_vm2, %v5034_v63 }
 0x164   : > { %v5481_v15 = vsel %vm1986_vm4, %v2006_v42, %v2008_v48 }
 0x166   : > { %4112 = vmatmul.mubr.msk.bf16.gmra.mrb[12].mxu0 %vm789_vm2, %v5456_v50 }
 0x167   : > { %4115 = vmatprep.mubr.msk.bf16.mxu0 %vm789_vm2, %v5461_v1 }
 0x16a   : > { %4002 = vmatmul.mubr.msk.bf16.gmra.mrb[52].mxu1 %vm789_vm2, %v5063_v59 }
 0x16b   : > { %4005 = vmatprep.mubr.msk.bf16.mxu1 %vm789_vm2, %v5068_v24  ;;  %v2010_v24 = vrot.slane %v5162_v52, 2 }
 0x16d   : > { %v5471_v63 = vpop.f32.mrb[0].mxu1  ;;  %v5498_v43 = vsel %vm1986_vm4, %v2008_v48, %v2010_v24  ;;  %v5505_v44 = vsel %vm1986_vm4, %v2010_v24, %v2012_v60 }
 0x16e   : > { %v5476_v7 = vpop.f32.mrb[1].mxu1  ;;  %4116 = vmatmul.mubr.msk.bf16.gmra.mrb[16].mxu0 %vm789_vm2, %v5474_v58 }
 0x16f   : > { %v5483_v47 = vpop.f32.mrb[2].mxu1  ;;  %4119 = vmatprep.mubr.msk.bf16.mxu0 %vm789_vm2, %v5481_v15 }
 0x170   : > { %v5487_v59 = vpop.f32.mrb[3].mxu1 }
 0x172   : > { %4006 = vmatmul.mubr.msk.bf16.gmra.mrb[56].mxu1 %vm789_vm2, %v5106_v25 }
 0x173   : > { %4009 = vmatprep.mubr.msk.bf16.mxu1 %vm789_vm2, %v5118_v14  ;;  %v2014_v14 = vrot.slane %v5213_v33, 2 }
 0x175   : > { %v5495_v45 = vpop.f32.mrb[4].mxu1  ;;  %v2015_v30 = vsel %vm1986_vm4, %v2012_v60, %v2014_v14  ;;  %v2017_v56 = vsel %vm1986_vm4, %v2014_v14, %v2016_v31 }
 0x176   : > { %v5500_v19 = vpop.f32.mrb[5].mxu1  ;;  %4120 = vmatmul.mubr.msk.bf16.gmra.mrb[56].mxu0 %vm789_vm2, %v5498_v43 }
 0x177   : > { %v5507_v38 = vpop.f32.mrb[6].mxu1  ;;  %4123 = vmatprep.mubr.msk.bf16.mxu0 %vm789_vm2, %v5505_v44 }
 0x178   : > { %v5511_v25 = vpop.f32.mrb[7].mxu1 }
 0x17a   : > { %4010 = vmatmul.mubr.msk.bf16.gmra.mrb[60].mxu1 %vm789_vm2, %v5153_v11 }
 0x17b   : > { %4013 = vmatprep.mubr.msk.bf16.mxu1 %vm789_vm2, %v5162_v52 }
 0x17d   : > { %v5519_v41 = vpop.f32.mrb[8].mxu1 }
 0x17e   : > { %v5522_v40 = vpop.f32.mrb[9].mxu1  ;;  %4124 = vmatmul.mubr.msk.bf16.gmra.mrb[60].mxu0 %vm789_vm2, %v2015_v30 }
 0x17f   : > { %v5526_v2 = vpop.f32.mrb[10].mxu1  ;;  %4127 = vmatprep.mubr.msk.bf16.mxu0 %vm789_vm2, %v2017_v56 }
 0x180   : > { %v5529_v11 = vpop.f32.mrb[11].mxu1 }
 0x182   : > { %4014 = vmatmul.mubr.msk.bf16.gmra.mrb[64].mxu1 %vm789_vm2, %v5208_v49 }
 0x183   : > { %4017 = vmatprep.mubr.msk.bf16.mxu1 %vm789_vm2, %v5213_v33 }
 0x185   : > { %v5535_v52 = vpop.f32.mrb[12].mxu1 }
 0x186   : > { %v5540_v46 = vpop.f32.mrb[13].mxu1  ;;  %4128 = vmatmul.mubr.msk.bf16.gmra.mrb[64].mxu0 %vm789_vm2, %v2019_v29 }
 0x187   : > { %v5543_v13 = vpop.f32.mrb[14].mxu1  ;;  %4131 = vmatprep.mubr.msk.bf16.mxu0 %vm789_vm2, %v5190_v5 }
 0x188   : > { %v5547_v23 = vpop.f32.mrb[15].mxu1 }
 0x18a   : > { %4018 = vmatmul.mubr.msk.bf16.gmra.mrb[68].mxu1 %vm789_vm2, %v5234_v32 }
 0x18b   : > { %4137 = vmatprep.mubr.msk.bf16.mxu1 %vm789_vm2, %v5395_v54 }
 0x18d   : > { %v5553_v61 = vpop.f32.mrb[16].mxu1 }
 0x18e   : > { %v5555_v21 = vpop.f32.mrb[17].mxu1  ;;  %4132 = vmatmul.mubr.msk.bf16.gmra.mrb[68].mxu0 %vm789_vm2, %v5193_v37 }
 0x18f   : > { %v5559_v49 = vpop.f32.mrb[18].mxu1  ;;  %4175 = vmatprep.mubr.msk.bf16.mxu0 %vm789_vm2, %v5395_v54 }
 0x190   : > { %v5563_v33 = vpop.f32.mrb[19].mxu1 }
 0x192   : > { %4138 = vmatmul.mubr.msk.bf16.vlgmr.msra.gmra.mrb[36].mxu1 %vm789_vm2, %v5408_v6 }
 0x193   : > { %4141 = vmatprep.mubr.msk.bf16.mxu1 %vm789_vm2, %v5413_v55 }
 0x196   : > { %4176 = vmatmul.mubr.msk.bf16.vlgmr.msra.gmra.mrb[20].mxu0 %vm789_vm2, %v5408_v6 }
 0x197   : > { %4179 = vmatprep.mubr.msk.bf16.mxu0 %vm789_vm2, %v5413_v55 }
 0x19a   : > { %4142 = vmatmul.mubr.msk.bf16.gmra.mrb[40].mxu1 %vm789_vm2, %v5424_v3 }
 0x19b   : > { %4145 = vmatprep.mubr.msk.bf16.mxu1 %vm789_vm2, %v5429_v18 }
 0x19e   : > { %4180 = vmatmul.mubr.msk.bf16.gmra.mrb[24].mxu0 %vm789_vm2, %v5424_v3 }
 0x19f   : > { %4183 = vmatprep.mubr.msk.bf16.mxu0 %vm789_vm2, %v5429_v18 }
 0x1a2   : > { %4146 = vmatmul.mubr.msk.bf16.gmra.mrb[44].mxu1 %vm789_vm2, %v5440_v8 }
 0x1a3   : > { %4149 = vmatprep.mubr.msk.bf16.mxu1 %vm789_vm2, %v5445_v22 }
 0x1a6   : > { %4184 = vmatmul.mubr.msk.bf16.gmra.mrb[28].mxu0 %vm789_vm2, %v5440_v8 }
 0x1a7   : > { %4187 = vmatprep.mubr.msk.bf16.mxu0 %vm789_vm2, %v5445_v22 }
 0x1aa   : > { %4150 = vmatmul.mubr.msk.bf16.gmra.mrb[48].mxu1 %vm789_vm2, %v5456_v50 }
 0x1ab   : > { %4153 = vmatprep.mubr.msk.bf16.mxu1 %vm789_vm2, %v5461_v1 }
 0x1ae   : > { %4188 = vmatmul.mubr.msk.bf16.gmra.mrb[32].mxu0 %vm789_vm2, %v5456_v50 }
 0x1af   : > { %4191 = vmatprep.mubr.msk.bf16.mxu0 %vm789_vm2, %v5461_v1 }
 0x1b2   : > { %4154 = vmatmul.mubr.msk.bf16.gmra.mrb[52].mxu1 %vm789_vm2, %v5474_v58 }
 0x1b3   : > { %4157 = vmatprep.mubr.msk.bf16.mxu1 %vm789_vm2, %v5481_v15 }
 0x1b5   : > { %v5601_v32 = vpop.f32.mrb[20].mxu1 }
 0x1b6   : > { %v5603_v34 = vpop.f32.mrb[21].mxu1  ;;  %4192 = vmatmul.mubr.msk.bf16.gmra.mrb[36].mxu0 %vm789_vm2, %v5474_v58 }
 0x1b7   : > { %v5607_v4 = vpop.f32.mrb[22].mxu1  ;;  %4195 = vmatprep.mubr.msk.bf16.mxu0 %vm789_vm2, %v5481_v15 }
 0x1b8   : > { %v5611_v36 = vpop.f32.mrb[23].mxu1 }
 0x1ba   : > { %4158 = vmatmul.mubr.msk.bf16.gmra.mrb[56].mxu1 %vm789_vm2, %v5498_v43 }
 0x1bb   : > { %4161 = vmatprep.mubr.msk.bf16.mxu1 %vm789_vm2, %v5505_v44 }
 0x1bd   : > { %v5617_v0 = vpop.f32.mrb[24].mxu1 }
 0x1be   : > { %v5619_v20 = vpop.f32.mrb[25].mxu1  ;;  %4196 = vmatmul.mubr.msk.bf16.gmra.mrb[40].mxu0 %vm789_vm2, %v5498_v43 }
 0x1bf   : > { %v5623_v10 = vpop.f32.mrb[26].mxu1  ;;  %4199 = vmatprep.mubr.msk.bf16.mxu0 %vm789_vm2, %v5505_v44 }
 0x1c0   : > { %v5627_v53 = vpop.f32.mrb[27].mxu1 }
 0x1c2   : > { %4162 = vmatmul.mubr.msk.bf16.gmra.mrb[60].mxu1 %vm789_vm2, %v2015_v30 }
 0x1c3   : > { %4165 = vmatprep.mubr.msk.bf16.mxu1 %vm789_vm2, %v2017_v56 }
 0x1c5   : > { %v5631_v57 = vpop.f32.mrb[28].mxu1 }
 0x1c6   : > { %v5633_v51 = vpop.f32.mrb[29].mxu1  ;;  %4200 = vmatmul.mubr.msk.bf16.gmra.mrb[44].mxu0 %vm789_vm2, %v2015_v30 }
 0x1c7   : > { %v5636_v54 = vpop.f32.mrb[30].mxu1  ;;  %4203 = vmatprep.mubr.msk.bf16.mxu0 %vm789_vm2, %v2017_v56 }
 0x1c8   : > { %v5639_v9 = vpop.f32.mrb[31].mxu1 }
 0x1ca   : > { %4166 = vmatmul.mubr.msk.bf16.gmra.mrb[64].mxu1 %vm789_vm2, %v2019_v29 }
 0x1cb   : > { %4169 = vmatprep.mubr.msk.bf16.mxu1 %vm789_vm2, %v5190_v5 }
 0x1cd   : > { %v5644_v27 = vpop.f32.mrb[32].mxu1 }
 0x1ce   : > { %v5646_v62 = vpop.f32.mrb[33].mxu1  ;;  %4204 = vmatmul.mubr.msk.bf16.gmra.mrb[48].mxu0 %vm789_vm2, %v2019_v29 }
 0x1cf   : > { %v5649_v26 = vpop.f32.mrb[34].mxu1  ;;  %4207 = vmatprep.mubr.msk.bf16.mxu0 %vm789_vm2, %v5190_v5 }
 0x1d0   : > { %v5653_v6 = vpop.f32.mrb[35].mxu1 }
 0x1d2   : > { %4170 = vmatmul.mubr.msk.bf16.gmra.mrb[68].mxu1 %vm789_vm2, %v5193_v37 }
 0x1d6   : > { %4208 = vmatmul.mubr.msk.bf16.gmra.mrb[52].mxu0 %vm789_vm2, %v5193_v37 }
 0x221   : > { %v4101_v55 = vpop.f32.mrb[0].mxu0 }
 0x222   : > { %v5660_v28 = vadd.f32 %v4101_v55, %v5471_v63  ;;  %v2115_v39 = vpop.f32.mrb[1].mxu0 }
 0x223   : > { %v5663_v3 = vadd.f32 %v2115_v39, %v5476_v7  ;;  %v4102_v18 = vpop.f32.mrb[2].mxu0 }
 0x224   : > { %v5666_v35 = vadd.f32 %v4102_v18, %v5483_v47  ;;  %v2118_v5 = vpop.f32.mrb[3].mxu0 }
 0x225   : > { %v5669_v16 = vadd.f32 %v2118_v5, %v5487_v59 }
 0x229   : > { %v4105_v8 = vpop.f32.mrb[4].mxu0 }
 0x22a   : > { %v5672_v22 = vadd.f32 %v4105_v8, %v5495_v45  ;;  %v2131_v37 = vpop.f32.mrb[5].mxu0 }
 0x22b   : > { %v5675_v17 = vadd.f32 %v2131_v37, %v5500_v19  ;;  %v4106_v12 = vpop.f32.mrb[6].mxu0 }
 0x22c   : > { %v5678_v50 = vadd.f32 %v4106_v12, %v5507_v38  ;;  %v2134_v1 = vpop.f32.mrb[7].mxu0 }
 0x22d   : > { %v5681_v42 = vadd.f32 %v2134_v1, %v5511_v25 }
 0x231   : > { %v4109_v48 = vpop.f32.mrb[8].mxu0 }
 0x232   : > { %v5684_v63 = vadd.f32 %v4109_v48, %v5519_v41  ;;  %v2147_v58 = vpop.f32.mrb[9].mxu0 }
 0x233   : > { %v5687_v7 = vadd.f32 %v2147_v58, %v5522_v40  ;;  %v4110_v15 = vpop.f32.mrb[10].mxu0 }
 0x234   : > { %v5690_v47 = vadd.f32 %v4110_v15, %v5526_v2  ;;  %v2150_v59 = vpop.f32.mrb[11].mxu0 }
 0x235   : > { %v5693_v24 = vadd.f32 %v2150_v59, %v5529_v11 }
 0x239   : > { %v4113_v60 = vpop.f32.mrb[12].mxu0 }
 0x23a   : > { %v5696_v45 = vadd.f32 %v4113_v60, %v5535_v52  ;;  %v2163_v43 = vpop.f32.mrb[13].mxu0 }
 0x23b   : > { %v5699_v19 = vadd.f32 %v2163_v43, %v5540_v46  ;;  %v4114_v44 = vpop.f32.mrb[14].mxu0 }
 0x23c   : > { %v5702_v38 = vadd.f32 %v4114_v44, %v5543_v13  ;;  %v2166_v25 = vpop.f32.mrb[15].mxu0 }
 0x23d   : > { %v5705_v14 = vadd.f32 %v2166_v25, %v5547_v23 }
 0x241   : > { %v4117_v31 = vpop.f32.mrb[16].mxu0 }
 0x242   : > { %v5708_v41 = vadd.f32 %v4117_v31, %v5553_v61  ;;  %v2179_v30 = vpop.f32.mrb[17].mxu0 }
 0x243   : > { %v5711_v40 = vadd.f32 %v2179_v30, %v5555_v21  ;;  %v4118_v56 = vpop.f32.mrb[18].mxu0 }
 0x244   : > { %v5714_v2 = vadd.f32 %v4118_v56, %v5559_v49  ;;  %v2182_v11 = vpop.f32.mrb[19].mxu0 }
 0x245   : > { %v5717_v52 = vadd.f32 %v2182_v11, %v5563_v33 }
 0x249   : > { %v4121_v29 = vpop.f32.mrb[56].mxu0 }
 0x24a   : > { %v5720_v46 = vadd.f32 %v4121_v29, %v5601_v32  ;;  %v2195_v13 = vpop.f32.mrb[57].mxu0 }
 0x24b   : > { %v5723_v23 = vadd.f32 %v2195_v13, %v5603_v34  ;;  %v4122_v61 = vpop.f32.mrb[58].mxu0 }
 0x24c   : > { %v5726_v21 = vadd.f32 %v4122_v61, %v5607_v4  ;;  %v2198_v55 = vpop.f32.mrb[59].mxu0 }
 0x24d   : > { %v5729_v49 = vadd.f32 %v2198_v55, %v5611_v36 }
 0x251   : > { %v4125_v39 = vpop.f32.mrb[60].mxu0 }
 0x252   : > { %v5732_v33 = vadd.f32 %v4125_v39, %v5617_v0  ;;  %v2211_v18 = vpop.f32.mrb[61].mxu0 }
 0x253   : > { %v5735_v32 = vadd.f32 %v2211_v18, %v5619_v20  ;;  %v4126_v5 = vpop.f32.mrb[62].mxu0 }
 0x254   : > { %v5738_v34 = vadd.f32 %v4126_v5, %v5623_v10  ;;  %v2214_v8 = vpop.f32.mrb[63].mxu0 }
 0x255   : > { %v5741_v4 = vadd.f32 %v2214_v8, %v5627_v53 }
 0x259   : > { %v4129_v37 = vpop.f32.mrb[64].mxu0 }
 0x25a   : > { %v5744_v36 = vadd.f32 %v4129_v37, %v5631_v57  ;;  %v2227_v12 = vpop.f32.mrb[65].mxu0 }
 0x25b   : > { %v5747_v0 = vadd.f32 %v2227_v12, %v5633_v51  ;;  %v4130_v1 = vpop.f32.mrb[66].mxu0 }
 0x25c   : > { %v5750_v20 = vadd.f32 %v4130_v1, %v5636_v54  ;;  %v2230_v48 = vpop.f32.mrb[67].mxu0 }
 0x25d   : > { %v5753_v10 = vadd.f32 %v2230_v48, %v5639_v9 }
 0x261   : > { %v4133_v58 = vpop.f32.mrb[68].mxu0 }
 0x262   : > { %v5756_v53 = vadd.f32 %v4133_v58, %v5644_v27  ;;  %v2243_v15 = vpop.f32.mrb[69].mxu0 }
 0x263   : > { %v5759_v57 = vadd.f32 %v2243_v15, %v5646_v62  ;;  %v4134_v59 = vpop.f32.mrb[70].mxu0 }
 0x264   : > { %v5762_v51 = vadd.f32 %v4134_v59, %v5649_v26  ;;  %v2246_v60 = vpop.f32.mrb[71].mxu0 }
 0x265   : > { %v5765_v54 = vadd.f32 %v2246_v60, %v5653_v6  ;;  %v4139_v43 = vpop.f32.mrb[36].mxu1 }
 0x266   : > { %v2333_v44 = vpop.f32.mrb[37].mxu1  ;;  %v2770_v25 = vrot.slane %v4139_v43, 1  ;;  %v5786_v43 = vld [vmem:[%s6374_s5] ss:$0 sm:$0xff] }
 0x267   : > { %v4140_v9 = vpop.f32.mrb[38].mxu1  ;;  %v2767_v27 = vrot.slane %v2333_v44, 1 }
 0x268   : > { %v2772_v31 = vrot.slane %v4140_v9, 1  ;;  %v2336_v30 = vpop.f32.mrb[39].mxu1 }
 0x269   : > { %v2768_v56 = vrot.slane %v2336_v30, 1  ;;  %v4177_v11 = vpop.f32.mrb[20].mxu0 }
 0x26a   : > { %v2773_v62 = vsel %vm751_vm3, %v2770_v25, %v2772_v31  ;;  %v2551_v29 = vpop.f32.mrb[21].mxu0  ;;  %v2951_v18 = vrot.slane %v4177_v11, 2 }
 0x26b   : > { %v2877_v13 = vadd.f32 %v5660_v28, %v2773_v62  ;;  %v2769_v26 = vsel %vm751_vm3, %v2767_v27, %v2768_v56  ;;  %v2771_v61 = vsel %vm751_vm3, %v2768_v56, %v2770_v25  ;;  %v4178_v6 = vpop.f32.mrb[22].mxu0  ;;  %v2948_v37 = vrot.slane %v2551_v29, 2  ;;  %v5777_v28 = vld [vmem:[%s6373_s4] ss:$0 sm:$0xff] }
 0x26c   : > { %v2875_v55 = vadd.f32 %v5663_v3, %v2769_v26  ;;  %v2876_v39 = vadd.f32 %v5669_v16, %v2771_v61  ;;  %v2953_v5 = vrot.slane %v4178_v6, 2  ;;  %v2554_v8 = vpop.f32.mrb[23].mxu0 }
 0x26d   : > { %v2949_v12 = vrot.slane %v2554_v8, 2  ;;  %v4143_v1 = vpop.f32.mrb[40].mxu1 }
 0x26e   : > { %v2954_v48 = vsel %vm1986_vm4, %v2951_v18, %v2953_v5  ;;  %v2349_v58 = vpop.f32.mrb[41].mxu1  ;;  %v2778_v25 = vrot.slane %v4143_v1, 1 }
 0x26f   : > { %v3058_v15 = vadd.f32 %v2954_v48, %v2877_v13  ;;  %v2950_v59 = vsel %vm1986_vm4, %v2948_v37, %v2949_v12  ;;  %v2952_v3 = vsel %vm1986_vm4, %v2949_v12, %v2951_v18  ;;  %v2774_v16 = vrot.slane %v2349_v58, 1  ;;  %v5781_v60 = vpop.f32.mrb[42].mxu1 }
 0x270   : > { %v3056_v44 = vadd.f32 %v2950_v59, %v2875_v55  ;;  %v3057_v9 = vadd.f32 %v2952_v3, %v2876_v39  ;;  %v2780_v30 = vrot.slane %v5781_v60, 1  ;;  %v2352_v27 = vpop.f32.mrb[43].mxu1 }
 0x271   : > { %v3101_v56 = vmul.f32 %v5777_v28, %v3058_v15  ;;  %v2775_v11 = vsel %vm751_vm3, %v2772_v31, %v2774_v16  ;;  %v2776_v62 = vrot.slane %v2352_v27, 1  ;;  %v4181_v29 = vpop.f32.mrb[24].mxu0 }
 0x272   : > { %v3099_v13 = vmul.f32 %v5777_v28, %v3056_v44  ;;  %v3100_v26 = vmul.f32 %v5777_v28, %v3057_v9  ;;  %v2878_v61 = vadd.f32 %v5666_v35, %v2775_v11  ;;  %v2781_v6 = vsel %vm751_vm3, %v2778_v25, %v2780_v30  ;;  %v2567_v55 = vpop.f32.mrb[25].mxu0 }
 0x273   : > { %v5798_v39 = vadd.f32 %v5786_v43, %v3101_v56  ;;  %v2881_v18 = vadd.f32 %v5672_v22, %v2781_v6  ;;  %v2777_v31 = vsel %vm751_vm3, %v2774_v16, %v2776_v62  ;;  %v2779_v8 = vsel %vm751_vm3, %v2776_v62, %v2778_v25  ;;  %v5803_v37 = vpop.f32.mrb[26].mxu0 }
 0x274   : > { %v3142_v12 = vadd.f32 %v5786_v43, %v3099_v13  ;;  %v3143_v35 = vadd.f32 %v5786_v43, %v3100_v26  ;;  %v2879_v1 = vadd.f32 %v5675_v17, %v2777_v31  ;;  %v2880_v48 = vadd.f32 %v5681_v42, %v2779_v8  ;;  %v2570_v58 = vpop.f32.mrb[27].mxu0  ;;  %v4550_v26 = vld [vmem:[%s4645_s26 + $0x10] sm:$0xff] }
 0x275   : > { %v3218_v15 = vrot.slane %v5798_v39, 5  ;;  %v2959_v59 = vrot.slane %v4181_v29, 2  ;;  %v2955_v22 = vrot.slane %v2567_v55, 2  ;;  %v6376_v3 = vrot.slane %v5803_v37, 2  ;;  %v4147_v16 = vpop.f32.mrb[44].mxu1 }
 0x276   : > { %v3215_v44 = vrot.slane %v3142_v12, 5  ;;  %v3216_v9 = vrot.slane %v3143_v35, 5  ;;  %v2957_v25 = vrot.slane %v2570_v58, 2  ;;  %v2365_v27 = vpop.f32.mrb[45].mxu1  ;;  %v2786_v56 = vrot.slane %v4147_v16, 1  ;;  %v4552_v12 = vld [vmem:[%s4645_s26 + $0x20] sm:$0xff] }
 0x277   : > { %v2956_v17 = vsel %vm1986_vm4, %v2953_v5, %v2955_v22  ;;  %v2962_v42 = vsel %vm1986_vm4, %v2959_v59, %v6376_v3  ;;  %v2782_v11 = vrot.slane %v2365_v27, 1  ;;  %v5816_v62 = vpop.f32.mrb[46].mxu1  ;;  %v4551_v5 = vld [vmem:[%s4645_s26 + $0x18] sm:$0xff] }
 0x278   : > { %v3217_v29 = vsel %vm3214_vm5, %v3215_v44, %v3216_v9  ;;  %v3219_v13 = vsel %vm3214_vm5, %v3216_v9, %v3218_v15  ;;  %v3323_v6 = vadd.f32 %v4550_v26, %v3215_v44  ;;  %v3059_v55 = vadd.f32 %v2956_v17, %v2878_v61  ;;  %v2368_v31 = vpop.f32.mrb[47].mxu1 }
 0x279   : > { %v3324_v8 = vadd.f32 %v4551_v5, %v3217_v29  ;;  %v3325_v35 = vadd.f32 %v4552_v12, %v3219_v13  ;;  %v3062_v58 = vadd.f32 %v2962_v42, %v2881_v18  ;;  %v2958_v16 = vsel %vm1986_vm4, %v2955_v22, %v2957_v25  ;;  %v5831_v27 = vpop.f32.mrb[28].mxu0 }
 0x27a   : > { %v3360_v9 = vmax.f32 %v3323_v6, 0.0  ;;  %v3102_v61 = vmul.f32 %v5777_v28, %v3059_v55  ;;  %v2960_v44 = vsel %vm1986_vm4, %v2957_v25, %v2959_v59  ;;  %v3060_v17 = vadd.f32 %v2958_v16, %v2879_v1  ;;  %v5835_v26 = vpop.f32.mrb[29].mxu0 }
 0x27b   : > { %v3361_v3 = vmax.f32 %v3324_v8, 0.0  ;;  %v3362_v29 = vmax.f32 %v3325_v35, 0.0  ;;  %v3105_v5 = vmul.f32 %v5777_v28, %v3062_v58  ;;  %v3061_v13 = vadd.f32 %v2960_v44, %v2880_v48  ;;  %v5838_v18 = vpop.f32.mrb[30].mxu0 }
 0x27c   : > { %3398 = vst.msk [vmem:[%s5826_s13 - $0x3] sm:$0xf8] %vm3397_vm6, %v3360_v9  ;;  %v3145_v22 = vadd.f32 %v5786_v43, %v3102_v61  ;;  %v3103_v42 = vmul.f32 %v5777_v28, %v3060_v17  ;;  %v2783_v59 = vsel %vm751_vm3, %v2780_v30, %v2782_v11  ;;  %v2788_v1 = vrot.slane %v5816_v62, 1  ;;  %v2586_v25 = vpop.f32.mrb[31].mxu0 }
 0x27d   : > { %3399 = vst.msk [vmem:[%s5826_s13 + $0x5] sm:$0xff] %vm662_vm1, %v3361_v3  ;;  %3400 = vst.msk [vmem:[%s5826_s13 + $0xd] sm:$0xff] %vm662_vm1, %v3362_v29  ;;  %v5853_v48 = vadd.f32 %v5786_v43, %v3105_v5  ;;  %v3104_v6 = vmul.f32 %v5777_v28, %v3061_v13  ;;  %v2882_v55 = vadd.f32 %v5678_v50, %v2783_v59  ;;  %v2784_v8 = vrot.slane %v2368_v31, 1  ;;  %v5857_v12 = vpop.f32.mrb[48].mxu1  ;;  %v4553_v13 = vld [vmem:[%s4645_s26 + $0x28] sm:$0xff] }
 0x27e   : > { %v3220_v60 = vrot.slane %v3145_v22, 5  ;;  %v3146_v30 = vadd.f32 %v5786_v43, %v3103_v42  ;;  %v2789_v3 = vsel %vm751_vm3, %v2786_v56, %v2788_v1  ;;  %v2967_v35 = vrot.slane %v5831_v27, 2  ;;  %v5864_v58 = vpop.f32.mrb[49].mxu1 }
 0x27f   : > { %v3226_v16 = vrot.slane %v5853_v48, 5  ;;  %v3147_v9 = vadd.f32 %v5786_v43, %v3104_v6  ;;  %v2885_v50 = vadd.f32 %v5684_v63, %v2789_v3  ;;  %v2785_v31 = vsel %vm751_vm3, %v2782_v11, %v2784_v8  ;;  %v5870_v61 = vpop.f32.mrb[50].mxu1 }
 0x280   : > { %v3221_v44 = vsel %vm3214_vm5, %v3218_v15, %v3220_v60  ;;  %v3222_v17 = vrot.slane %v3146_v30, 5  ;;  %v2787_v29 = vsel %vm751_vm3, %v2784_v8, %v2786_v56  ;;  %v2883_v27 = vadd.f32 %v5687_v7, %v2785_v31  ;;  %v5877_v5 = vpop.f32.mrb[51].mxu1 }
 0x281   : > { %v3326_v22 = vadd.f32 %v4553_v13, %v3221_v44  ;;  %v3224_v63 = vrot.slane %v3147_v9, 5  ;;  %v2884_v11 = vadd.f32 %v5693_v24, %v2787_v29  ;;  %v2963_v42 = vrot.slane %v5835_v26, 2  ;;  %v5882_v39 = vpop.f32.mrb[32].mxu0  ;;  %v4554_v26 = vld [vmem:[%s4645_s26 + $0x30] sm:$0xff]  ;;  %v4556_v44 = vld [vmem:[%s4645_s26 + $0x40] sm:$0xff] }
 0x282   : > { %v3223_v15 = vsel %vm3214_vm5, %v3220_v60, %v3222_v17  ;;  %v2969_v56 = vrot.slane %v5838_v18, 2  ;;  %v2965_v59 = vrot.slane %v2586_v25, 2  ;;  %v2794_v7 = vrot.slane %v5857_v12, 1  ;;  %v5887_v6 = vpop.f32.mrb[33].mxu0  ;;  %v4555_v60 = vld [vmem:[%s4645_s26 + $0x38] sm:$0xff] }
 0x283   : > { %v3363_v8 = vmax.f32 %v3326_v22, 0.0  ;;  %v3225_v30 = vsel %vm3214_vm5, %v3222_v17, %v3224_v63  ;;  %v3227_v24 = vsel %vm3214_vm5, %v3224_v63, %v3226_v16  ;;  %v3327_v3 = vadd.f32 %v4554_v26, %v3223_v15  ;;  %v5894_v9 = vpop.f32.mrb[34].mxu0  ;;  %v4559_v18 = vld [vmem:[%s4645_s26 + $0x58] sm:$0xff] }
 0x284   : > { %v3328_v31 = vadd.f32 %v4555_v60, %v3225_v30  ;;  %v3329_v25 = vadd.f32 %v4556_v44, %v3227_v24  ;;  %v6377_v12 = vrot.slane %v5803_v37, 2  ;;  %v2970_v17 = vsel %vm1986_vm4, %v2967_v35, %v2969_v56  ;;  %v5904_v13 = vpop.f32.mrb[35].mxu0 }
 0x285   : > { %3401 = vst.msk [vmem:[%s5826_s13 + $0x15] sm:$0xff] %vm662_vm1, %v3363_v8  ;;  %v3364_v22 = vmax.f32 %v3327_v3, 0.0  ;;  %v3066_v15 = vadd.f32 %v2970_v17, %v2885_v50  ;;  %v2966_v30 = vsel %vm1986_vm4, %v2963_v42, %v2965_v59  ;;  %v5909_v24 = vpop.f32.mrb[52].mxu1  ;;  %v2968_v60 = vsel %vm1986_vm4, %v2965_v59, %v2967_v35 }
 0x286   : > { %v2964_v29 = vsel %vm1986_vm4, %v6377_v12, %v2963_v42  ;;  %v3365_v37 = vmax.f32 %v3328_v31, 0.0  ;;  %v3366_v26 = vmax.f32 %v3329_v25, 0.0  ;;  %v3064_v44 = vadd.f32 %v2966_v30, %v2883_v27  ;;  %v5912_v12 = vpop.f32.mrb[53].mxu1 }
 0x287   : > { %v3063_v63 = vadd.f32 %v2964_v29, %v2882_v55  ;;  %3402 = vst.msk [vmem:[%s5826_s13 + $0x1d] sm:$0xff] %vm662_vm1, %v3364_v22  ;;  %v3109_v3 = vmul.f32 %v5777_v28, %v3066_v15  ;;  %v3065_v55 = vadd.f32 %v2968_v60, %v2884_v11  ;;  %v2790_v50 = vrot.slane %v5864_v58, 1  ;;  %v5919_v29 = vpop.f32.mrb[54].mxu1 }
 0x288   : > { %3403 = vst.msk [vmem:[%s5826_s13 + $0x25] sm:$0xff] %vm662_vm1, %v3365_v37  ;;  %3404 = vst.msk [vmem:[%s5826_s13 + $0x2d] sm:$0xff] %vm662_vm1, %v3366_v26  ;;  %v3107_v35 = vmul.f32 %v5777_v28, %v3064_v44  ;;  %v2796_v27 = vrot.slane %v5870_v61, 1  ;;  %v2792_v42 = vrot.slane %v5877_v5, 1  ;;  %v2975_v59 = vrot.slane %v5882_v39, 2  ;;  %v5929_v31 = vpop.f32.mrb[55].mxu1 }
 0x289   : > { %v3106_v8 = vmul.f32 %v5777_v28, %v3063_v63  ;;  %v5933_v58 = vadd.f32 %v5786_v43, %v3109_v3  ;;  %v3108_v25 = vmul.f32 %v5777_v28, %v3065_v55  ;;  %v2791_v17 = vsel %vm751_vm3, %v2788_v1, %v2790_v50  ;;  %v5939_v22 = vpop.f32.mrb[36].mxu0 }
 0x28a   : > { %v3150_v63 = vadd.f32 %v5786_v43, %v3107_v35  ;;  %v2886_v5 = vadd.f32 %v5690_v47, %v2791_v17  ;;  %v2797_v39 = vsel %vm751_vm3, %v2794_v7, %v2796_v27  ;;  %v2793_v15 = vsel %vm751_vm3, %v2790_v50, %v2792_v42  ;;  %v5947_v30 = vpop.f32.mrb[37].mxu0 }
 0x28b   : > { %v3149_v11 = vadd.f32 %v5786_v43, %v3106_v8  ;;  %v3234_v62 = vrot.slane %v5933_v58, 5  ;;  %v3151_v1 = vadd.f32 %v5786_v43, %v3108_v25  ;;  %v2889_v26 = vadd.f32 %v5696_v45, %v2797_v39  ;;  %v5952_v60 = vpop.f32.mrb[38].mxu0 }
 0x28c   : > { %v3230_v44 = vrot.slane %v3150_v63, 5  ;;  %v2795_v47 = vsel %vm751_vm3, %v2792_v42, %v2794_v7  ;;  %v2887_v8 = vadd.f32 %v5699_v19, %v2793_v15  ;;  %v2971_v3 = vrot.slane %v5887_v6, 2  ;;  %v5957_v55 = vpop.f32.mrb[39].mxu0  ;;  %v4557_v7 = vld [vmem:[%s4645_s26 + $0x48] sm:$0xff]  ;;  %v4558_v63 = vld [vmem:[%s4645_s26 + $0x50] sm:$0xff] }
 0x28d   : > { %v3228_v37 = vrot.slane %v3149_v11, 5  ;;  %v3232_v35 = vrot.slane %v3151_v1, 5  ;;  %v2888_v11 = vadd.f32 %v5705_v14, %v2795_v47  ;;  %v2977_v45 = vrot.slane %v5894_v9, 2  ;;  %v5964_v25 = vpop.f32.mrb[56].mxu1 }
 0x28e   : > { %v2972_v6 = vsel %vm1986_vm4, %v2969_v56, %v2971_v3  ;;  %v2973_v48 = vrot.slane %v5904_v13, 2  ;;  %v4560_v56 = vld [vmem:[%s4645_s26 + $0x60] sm:$0xff] }
 0x28f   : > { %v3229_v50 = vsel %vm3214_vm5, %v3226_v16, %v3228_v37  ;;  %v3231_v42 = vsel %vm3214_vm5, %v3228_v37, %v3230_v44  ;;  %v5972_v16 = vpop.f32.mrb[57].mxu1  ;;  %v3233_v14 = vsel %vm3214_vm5, %v3230_v44, %v3232_v35  ;;  %v3235_v17 = vsel %vm3214_vm5, %v3232_v35, %v3234_v62 }
 0x290   : > { %v3330_v19 = vadd.f32 %v4557_v7, %v3229_v50  ;;  %v3331_v39 = vadd.f32 %v4558_v63, %v3231_v42  ;;  %v3067_v15 = vadd.f32 %v2972_v6, %v2886_v5  ;;  %v5979_v1 = vpop.f32.mrb[58].mxu1  ;;  %v3332_v47 = vadd.f32 %v4559_v18, %v3233_v14 }
 0x291   : > { %v3333_v13 = vadd.f32 %v4560_v56, %v3235_v17  ;;  %v2978_v44 = vsel %vm1986_vm4, %v2975_v59, %v2977_v45  ;;  %v5986_v50 = vpop.f32.mrb[59].mxu1  ;;  %v2974_v5 = vsel %vm1986_vm4, %v2971_v3, %v2973_v48  ;;  %v2976_v17 = vsel %vm1986_vm4, %v2973_v48, %v2975_v59 }
 0x292   : > { %v3367_v37 = vmax.f32 %v3330_v19, 0.0  ;;  %v3368_v7 = vmax.f32 %v3331_v39, 0.0  ;;  %v3110_v35 = vmul.f32 %v5777_v28, %v3067_v15  ;;  %v3070_v42 = vadd.f32 %v2978_v44, %v2889_v26  ;;  %v5990_v19 = vpop.f32.mrb[40].mxu0 }
 0x293   : > { %v3369_v6 = vmax.f32 %v3332_v47, 0.0  ;;  %v3370_v14 = vmax.f32 %v3333_v13, 0.0  ;;  %v3068_v63 = vadd.f32 %v2974_v5, %v2887_v8  ;;  %v5995_v18 = vpop.f32.mrb[41].mxu0  ;;  %v3069_v15 = vadd.f32 %v2976_v17, %v2888_v11 }
 0x294   : > { %3405 = vst.msk [vmem:[%s5826_s13 + $0x35] sm:$0xff] %vm662_vm1, %v3367_v37  ;;  %3406 = vst.msk [vmem:[%s5826_s13 + $0x3d] sm:$0xff] %vm662_vm1, %v3368_v7  ;;  %v3153_v39 = vadd.f32 %v5786_v43, %v3110_v35  ;;  %v3113_v26 = vmul.f32 %v5777_v28, %v3070_v42  ;;  %v2802_v3 = vrot.slane %v5909_v24, 1  ;;  %v6002_v56 = vpop.f32.mrb[42].mxu0  ;;  %v2798_v8 = vrot.slane %v5912_v12, 1 }
 0x295   : > { %3407 = vst.msk [vmem:[%s5826_s13 + $0x45] sm:$0xff] %vm662_vm1, %v3369_v6  ;;  %3408 = vst.msk [vmem:[%s5826_s13 + $0x4d] sm:$0xff] %vm662_vm1, %v3370_v14  ;;  %v3111_v59 = vmul.f32 %v5777_v28, %v3068_v63  ;;  %v2804_v48 = vrot.slane %v5919_v29, 1  ;;  %v2800_v37 = vrot.slane %v5929_v31, 1  ;;  %v6012_v47 = vpop.f32.mrb[43].mxu0  ;;  %v3112_v13 = vmul.f32 %v5777_v28, %v3069_v15  ;;  %v6019_v7 = vpop.f32.mrb[60].mxu1 }
 0x296   : > { %v3236_v11 = vrot.slane %v3153_v39, 5  ;;  %v6015_v24 = vadd.f32 %v5786_v43, %v3113_v26  ;;  %v2983_v44 = vrot.slane %v5939_v22, 2  ;;  %v2799_v12 = vsel %vm751_vm3, %v2796_v27, %v2798_v8  ;;  %v6029_v5 = vpop.f32.mrb[61].mxu1  ;;  %v4561_v27 = vld [vmem:[%s4645_s26 + $0x68] sm:$0xff] }
 0x297   : > { %v3154_v35 = vadd.f32 %v5786_v43, %v3111_v59  ;;  %v2805_v31 = vsel %vm751_vm3, %v2802_v3, %v2804_v48  ;;  %v2801_v42 = vsel %vm751_vm3, %v2798_v8, %v2800_v37  ;;  %v3155_v14 = vadd.f32 %v5786_v43, %v3112_v13  ;;  %v6037_v17 = vpop.f32.mrb[62].mxu1 }
 0x298   : > { %v3237_v22 = vsel %vm3214_vm5, %v3234_v62, %v3236_v11  ;;  %v3242_v6 = vrot.slane %v6015_v24, 5  ;;  %v2890_v61 = vadd.f32 %v5702_v38, %v2799_v12  ;;  %v2893_v26 = vadd.f32 %v5708_v41, %v2805_v31  ;;  %v6042_v59 = vpop.f32.mrb[63].mxu1 }
 0x299   : > { %v3334_v63 = vadd.f32 %v4561_v27, %v3237_v22  ;;  %v3238_v39 = vrot.slane %v3154_v35, 5  ;;  %v2803_v15 = vsel %vm751_vm3, %v2800_v37, %v2802_v3  ;;  %v3240_v58 = vrot.slane %v3155_v14, 5  ;;  %v6047_v13 = vpop.f32.mrb[44].mxu0  ;;  %v4564_v14 = vld [vmem:[%s4645_s26 + $0x80] sm:$0xff] }
 0x29a   : > { %v2891_v62 = vadd.f32 %v5711_v40, %v2801_v42  ;;  %v2892_v8 = vadd.f32 %v5717_v52, %v2803_v15  ;;  %v2979_v38 = vrot.slane %v5947_v30, 2  ;;  %v2985_v41 = vrot.slane %v5952_v60, 2  ;;  %v6052_v37 = vpop.f32.mrb[45].mxu0  ;;  %v4562_v52 = vld [vmem:[%s4645_s26 + $0x70] sm:$0xff] }
 0x29b   : > { %v3371_v35 = vmax.f32 %v3334_v63, 0.0  ;;  %v3239_v12 = vsel %vm3214_vm5, %v3236_v11, %v3238_v39  ;;  %v2981_v3 = vrot.slane %v5957_v55, 2  ;;  %v3241_v31 = vsel %vm3214_vm5, %v3238_v39, %v3240_v58  ;;  %v6062_v22 = vpop.f32.mrb[46].mxu0  ;;  %v4563_v11 = vld [vmem:[%s4645_s26 + $0x78] sm:$0xff] }
 0x29c   : > { %v3243_v40 = vsel %vm3214_vm5, %v3240_v58, %v3242_v6  ;;  %v3335_v30 = vadd.f32 %v4562_v52, %v3239_v12  ;;  %v2980_v42 = vsel %vm1986_vm4, %v2977_v45, %v2979_v38  ;;  %v3336_v55 = vadd.f32 %v4563_v11, %v3241_v31  ;;  %v6071_v15 = vpop.f32.mrb[47].mxu0 }
 0x29d   : > { %3409 = vst.msk [vmem:[%s5826_s13 + $0x55] sm:$0xff] %vm662_vm1, %v3371_v35  ;;  %v3337_v27 = vadd.f32 %v4564_v14, %v3243_v40  ;;  %v3071_v63 = vadd.f32 %v2980_v42, %v2890_v61  ;;  %v2986_v39 = vsel %vm1986_vm4, %v2983_v44, %v2985_v41  ;;  %v2982_v45 = vsel %vm1986_vm4, %v2979_v38, %v2981_v3  ;;  %v6075_v12 = vpop.f32.mrb[64].mxu1 }
 0x29e   : > { %v3372_v58 = vmax.f32 %v3335_v30, 0.0  ;;  %v3074_v9 = vadd.f32 %v2986_v39, %v2893_v26  ;;  %v2984_v35 = vsel %vm1986_vm4, %v2981_v3, %v2983_v44  ;;  %v3373_v31 = vmax.f32 %v3336_v55, 0.0  ;;  %v6078_v42 = vpop.f32.mrb[65].mxu1 }
 0x29f   : > { %v3374_v52 = vmax.f32 %v3337_v27, 0.0  ;;  %v3114_v61 = vmul.f32 %v5777_v28, %v3071_v63  ;;  %v3072_v40 = vadd.f32 %v2982_v45, %v2891_v62  ;;  %v3073_v11 = vadd.f32 %v2984_v35, %v2892_v8  ;;  %v6085_v14 = vpop.f32.mrb[66].mxu1 }
 0x2a0   : > { %3410 = vst.msk [vmem:[%s5826_s13 + $0x5d] sm:$0xff] %vm662_vm1, %v3372_v58  ;;  %v3117_v30 = vmul.f32 %v5777_v28, %v3074_v9  ;;  %v2810_v26 = vrot.slane %v5964_v25, 1  ;;  %v2806_v38 = vrot.slane %v5972_v16, 1  ;;  %3411 = vst.msk [vmem:[%s5826_s13 + $0x65] sm:$0xff] %vm662_vm1, %v3373_v31  ;;  %v2812_v3 = vrot.slane %v5979_v1, 1  ;;  %v6095_v27 = vpop.f32.mrb[67].mxu1 }
 0x2a1   : > { %3412 = vst.msk [vmem:[%s5826_s13 + $0x6d] sm:$0xff] %vm662_vm1, %v3374_v52  ;;  %v3157_v44 = vadd.f32 %v5786_v43, %v3114_v61  ;;  %v3115_v62 = vmul.f32 %v5777_v28, %v3072_v40  ;;  %v2808_v55 = vrot.slane %v5986_v50, 1  ;;  %v3116_v16 = vmul.f32 %v5777_v28, %v3073_v11  ;;  %v6105_v39 = vpop.f32.mrb[48].mxu0 }
 0x2a2   : > { %v6098_v25 = vadd.f32 %v5786_v43, %v3117_v30  ;;  %v2807_v8 = vsel %vm751_vm3, %v2804_v48, %v2806_v38  ;;  %v2991_v63 = vrot.slane %v5990_v19, 2  ;;  %v2813_v45 = vsel %vm751_vm3, %v2810_v26, %v2812_v3  ;;  %v6112_v35 = vpop.f32.mrb[49].mxu0 }
 0x2a3   : > { %v3244_v58 = vrot.slane %v3157_v44, 5  ;;  %v3158_v9 = vadd.f32 %v5786_v43, %v3115_v62  ;;  %v2894_v50 = vadd.f32 %v5714_v2, %v2807_v8  ;;  %v3159_v48 = vadd.f32 %v5786_v43, %v3116_v16  ;;  %v6118_v52 = vpop.f32.mrb[50].mxu0  ;;  %v4565_v44 = vld [vmem:[%s4645_s26 + $0x88] sm:$0xff] }
 0x2a4   : > { %v3250_v29 = vrot.slane %v6098_v25, 5  ;;  %v2897_v19 = vadd.f32 %v5720_v46, %v2813_v45  ;;  %v2809_v31 = vsel %vm751_vm3, %v2806_v38, %v2808_v55  ;;  %v2811_v40 = vsel %vm751_vm3, %v2808_v55, %v2810_v26  ;;  %v6125_v11 = vpop.f32.mrb[51].mxu0 }
 0x2a5   : > { %v3245_v2 = vsel %vm3214_vm5, %v3242_v6, %v3244_v58  ;;  %v3246_v61 = vrot.slane %v3158_v9, 5  ;;  %v2895_v30 = vadd.f32 %v5723_v23, %v2809_v31  ;;  %v3248_v46 = vrot.slane %v3159_v48, 5  ;;  %v6130_v24 = vpop.f32.mrb[68].mxu1 }
 0x2a6   : > { %v3338_v62 = vadd.f32 %v4565_v44, %v3245_v2  ;;  %v2896_v38 = vadd.f32 %v5729_v49, %v2811_v40  ;;  %v2987_v16 = vrot.slane %v5995_v18, 2  ;;  %v2993_v26 = vrot.slane %v6002_v56, 2  ;;  %v6136_v8 = vpop.f32.mrb[69].mxu1  ;;  %v4566_v18 = vld [vmem:[%s4645_s26 + $0x90] sm:$0xff]  ;;  %v4568_v40 = vld [vmem:[%s4645_s26 + $0xa0] sm:$0xff] }
 0x2a7   : > { %v3247_v6 = vsel %vm3214_vm5, %v3244_v58, %v3246_v61  ;;  %v2989_v23 = vrot.slane %v6012_v47, 2  ;;  %v2818_v55 = vrot.slane %v6019_v7, 1  ;;  %v3249_v45 = vsel %vm3214_vm5, %v3246_v61, %v3248_v46  ;;  %v6143_v31 = vpop.f32.mrb[70].mxu1  ;;  %v4567_v58 = vld [vmem:[%s4645_s26 + $0x98] sm:$0xff] }
 0x2a8   : > { %v3375_v9 = vmax.f32 %v3338_v62, 0.0  ;;  %v3251_v49 = vsel %vm3214_vm5, %v3248_v46, %v3250_v29  ;;  %v3339_v48 = vadd.f32 %v4566_v18, %v3247_v6  ;;  %v3340_v2 = vadd.f32 %v4567_v58, %v3249_v45  ;;  %v6153_v44 = vpop.f32.mrb[71].mxu1 }
 0x2a9   : > { %v3341_v47 = vadd.f32 %v4568_v40, %v3251_v49  ;;  %v2988_v7 = vsel %vm1986_vm4, %v2985_v41, %v2987_v16  ;;  %v2994_v61 = vsel %vm1986_vm4, %v2991_v63, %v2993_v26  ;;  %v2990_v45 = vsel %vm1986_vm4, %v2987_v16, %v2989_v23  ;;  %v6158_v49 = vpop.f32.mrb[52].mxu0 }
 0x2aa   : > { %3413 = vst.msk [vmem:[%s5826_s13 + $0x75] sm:$0xff] %vm662_vm1, %v3375_v9  ;;  %v3376_v62 = vmax.f32 %v3339_v48, 0.0  ;;  %v3075_v46 = vadd.f32 %v2988_v7, %v2894_v50  ;;  %v3078_v6 = vadd.f32 %v2994_v61, %v2897_v19  ;;  %v3377_v60 = vmax.f32 %v3340_v2, 0.0  ;;  %v6161_v40 = vpop.f32.mrb[53].mxu0 }
 0x2ab   : > { %v3378_v18 = vmax.f32 %v3341_v47, 0.0  ;;  %v2992_v41 = vsel %vm1986_vm4, %v2989_v23, %v2991_v63  ;;  %v3076_v58 = vadd.f32 %v2990_v45, %v2895_v30  ;;  %v2814_v19 = vrot.slane %v6029_v5, 1  ;;  %v6168_v7 = vpop.f32.mrb[54].mxu0 }
 0x2ac   : > { %3414 = vst.msk [vmem:[%s5826_s13 + $0x7d] sm:$0xff] %vm662_vm1, %v3376_v62  ;;  %v3118_v9 = vmul.f32 %v5777_v28, %v3075_v46  ;;  %v3121_v48 = vmul.f32 %v5777_v28, %v3078_v6  ;;  %v3077_v50 = vadd.f32 %v2992_v41, %v2896_v38  ;;  %3415 = vst.msk [vmem:[%s5826_s13 + $0x85] sm:$0xff] %vm662_vm1, %v3377_v60  ;;  %v2820_v30 = vrot.slane %v6037_v17, 1  ;;  %v6178_v2 = vpop.f32.mrb[55].mxu0 }
 0x2ad   : > { %3416 = vst.msk [vmem:[%s5826_s13 + $0x8d] sm:$0xff] %vm662_vm1, %v3378_v18  ;;  %v3119_v63 = vmul.f32 %v5777_v28, %v3076_v58  ;;  %v2816_v16 = vrot.slane %v6042_v59, 1  ;;  %v2999_v23 = vrot.slane %v6047_v13, 2  ;;  %v2815_v61 = vsel %vm751_vm3, %v2812_v3, %v2814_v19 }
 0x2ae   : > { %v3161_v38 = vadd.f32 %v5786_v43, %v3118_v9  ;;  %v6182_v5 = vadd.f32 %v5786_v43, %v3121_v48  ;;  %v3120_v47 = vmul.f32 %v5777_v28, %v3077_v50  ;;  %v2898_v59 = vadd.f32 %v5726_v21, %v2815_v61  ;;  %v4572_v61 = vld [vmem:[%s4645_s26 + $0xc0] sm:$0xff] }
 0x2af   : > { %v3162_v62 = vadd.f32 %v5786_v43, %v3119_v63  ;;  %v2821_v13 = vsel %vm751_vm3, %v2818_v55, %v2820_v30  ;;  %v2817_v46 = vsel %vm751_vm3, %v2814_v19, %v2816_v16  ;;  %v2819_v18 = vsel %vm751_vm3, %v2816_v16, %v2818_v55  ;;  %v4570_v55 = vld [vmem:[%s4645_s26 + $0xb0] sm:$0xff] }
 0x2b0   : > { %v3252_v6 = vrot.slane %v3161_v38, 5  ;;  %v3258_v45 = vrot.slane %v6182_v5, 5  ;;  %v3163_v60 = vadd.f32 %v5786_v43, %v3120_v47  ;;  %v2901_v1 = vadd.f32 %v5732_v33, %v2821_v13  ;;  %v4569_v33 = vld [vmem:[%s4645_s26 + $0xa8] sm:$0xff]  ;;  %v4571_v5 = vld [vmem:[%s4645_s26 + $0xb8] sm:$0xff] }
 0x2b1   : > { %v3254_v3 = vrot.slane %v3162_v62, 5  ;;  %v2899_v41 = vadd.f32 %v5735_v32, %v2817_v46  ;;  %v2995_v21 = vrot.slane %v6052_v37, 2  ;;  %v2900_v48 = vadd.f32 %v5741_v4, %v2819_v18 }
 0x2b2   : > { %v3253_v58 = vsel %vm3214_vm5, %v3250_v29, %v3252_v6  ;;  %v3256_v9 = vrot.slane %v3163_v60, 5  ;;  %v3001_v50 = vrot.slane %v6062_v22, 2  ;;  %v2997_v37 = vrot.slane %v6071_v15, 2 }
 0x2b3   : > { %v3342_v19 = vadd.f32 %v4569_v33, %v3253_v58  ;;  %v3255_v63 = vsel %vm3214_vm5, %v3252_v6, %v3254_v3  ;;  %v2996_v32 = vsel %vm1986_vm4, %v2993_v26, %v2995_v21  ;;  %v2826_v33 = vrot.slane %v6075_v12, 1 }
 0x2b4   : > { %v3257_v25 = vsel %vm3214_vm5, %v3254_v3, %v3256_v9  ;;  %v3259_v29 = vsel %vm3214_vm5, %v3256_v9, %v3258_v45  ;;  %v3343_v16 = vadd.f32 %v4570_v55, %v3255_v63  ;;  %v3079_v4 = vadd.f32 %v2996_v32, %v2898_v59 }
 0x2b5   : > { %v3379_v38 = vmax.f32 %v3342_v19, 0.0  ;;  %v3344_v47 = vadd.f32 %v4571_v5, %v3257_v25  ;;  %v3345_v62 = vadd.f32 %v4572_v61, %v3259_v29  ;;  %v3002_v56 = vsel %vm1986_vm4, %v2999_v23, %v3001_v50 }
 0x2b6   : > { %v3380_v15 = vmax.f32 %v3343_v16, 0.0  ;;  %v3122_v26 = vmul.f32 %v5777_v28, %v3079_v4  ;;  %v3082_v13 = vadd.f32 %v3002_v56, %v2901_v1  ;;  %v2998_v46 = vsel %vm1986_vm4, %v2995_v21, %v2997_v37 }
 0x2b7   : > { %3417 = vst.msk [vmem:[%s5826_s13 + $0x95] sm:$0xff] %vm662_vm1, %v3379_v38  ;;  %v3381_v59 = vmax.f32 %v3344_v47, 0.0  ;;  %v3382_v6 = vmax.f32 %v3345_v62, 0.0  ;;  %v3000_v60 = vsel %vm1986_vm4, %v2997_v37, %v2999_v23  ;;  %v3080_v3 = vadd.f32 %v2998_v46, %v2899_v41  ;;  %v4576_v46 = vld [vmem:[%s4645_s26 + $0xe0] sm:$0xff] }
 0x2b8   : > { %3418 = vst.msk [vmem:[%s5826_s13 + $0x9d] sm:$0xff] %vm662_vm1, %v3380_v15  ;;  %v3165_v18 = vadd.f32 %v5786_v43, %v3122_v26  ;;  %v3125_v58 = vmul.f32 %v5777_v28, %v3082_v13  ;;  %v3081_v9 = vadd.f32 %v3000_v60, %v2900_v48  ;;  %v2822_v21 = vrot.slane %v6078_v42, 1  ;;  %v4574_v26 = vld [vmem:[%s4645_s26 + $0xd0] sm:$0xff] }
 0x2b9   : > { %3419 = vst.msk [vmem:[%s5826_s13 + $0xa5] sm:$0xff] %vm662_vm1, %v3381_v59  ;;  %3420 = vst.msk [vmem:[%s5826_s13 + $0xad] sm:$0xff] %vm662_vm1, %v3382_v6  ;;  %v3123_v1 = vmul.f32 %v5777_v28, %v3080_v3  ;;  %v2828_v23 = vrot.slane %v6085_v14, 1  ;;  %v2824_v41 = vrot.slane %v6095_v27, 1  ;;  %v3007_v12 = vrot.slane %v6105_v39, 2  ;;  %v4573_v39 = vld [vmem:[%s4645_s26 + $0xc8] sm:$0xff] }
 0x2ba   : > { %v3260_v19 = vrot.slane %v3165_v18, 5  ;;  %v6238_v63 = vadd.f32 %v5786_v43, %v3125_v58  ;;  %v3124_v48 = vmul.f32 %v5777_v28, %v3081_v9  ;;  %v2823_v37 = vsel %vm751_vm3, %v2820_v30, %v2822_v21 }
 0x2bb   : > { %v3166_v32 = vadd.f32 %v5786_v43, %v3123_v1  ;;  %v2829_v42 = vsel %vm751_vm3, %v2826_v33, %v2828_v23  ;;  %v2825_v14 = vsel %vm751_vm3, %v2822_v21, %v2824_v41  ;;  %v2902_v55 = vadd.f32 %v5738_v34, %v2823_v37 }
 0x2bc   : > { %v3261_v27 = vsel %vm3214_vm5, %v3258_v45, %v3260_v19  ;;  %v3266_v25 = vrot.slane %v6238_v63, 5  ;;  %v3167_v29 = vadd.f32 %v5786_v43, %v3124_v48  ;;  %v2905_v17 = vadd.f32 %v5744_v36, %v2829_v42 }
 0x2bd   : > { %v3346_v16 = vadd.f32 %v4573_v39, %v3261_v27  ;;  %v3262_v4 = vrot.slane %v3166_v32, 5  ;;  %v2827_v30 = vsel %vm751_vm3, %v2824_v41, %v2826_v33  ;;  %v2903_v45 = vadd.f32 %v5747_v0, %v2825_v14 }
 0x2be   : > { %v3264_v38 = vrot.slane %v3167_v29, 5  ;;  %v2904_v5 = vadd.f32 %v5753_v10, %v2827_v30  ;;  %v3003_v47 = vrot.slane %v6112_v35, 2  ;;  %v3009_v62 = vrot.slane %v6118_v52, 2  ;;  %v4575_v10 = vld [vmem:[%s4645_s26 + $0xd8] sm:$0xff] }
 0x2bf   : > { %v3383_v61 = vmax.f32 %v3346_v16, 0.0  ;;  %v3263_v34 = vsel %vm3214_vm5, %v3260_v19, %v3262_v4  ;;  %v3005_v56 = vrot.slane %v6125_v11, 2  ;;  %v2834_v41 = vrot.slane %v6130_v24, 1 }
 0x2c0   : > { %v3265_v36 = vsel %vm3214_vm5, %v3262_v4, %v3264_v38  ;;  %v3267_v15 = vsel %vm3214_vm5, %v3264_v38, %v3266_v25  ;;  %v3347_v13 = vadd.f32 %v4574_v26, %v3263_v34  ;;  %v3004_v0 = vsel %vm1986_vm4, %v3001_v50, %v3003_v47  ;;  %v4579_v26 = vld [vmem:[%s4645_s26 + $0xf8] sm:$0xff] }
 0x2c1   : > { %3421 = vst.msk [vmem:[%s5826_s13 + $0xb5] sm:$0xff] %vm662_vm1, %v3383_v61  ;;  %v3348_v35 = vadd.f32 %v4575_v10, %v3265_v36  ;;  %v3349_v59 = vadd.f32 %v4576_v46, %v3267_v15  ;;  %v3083_v6 = vadd.f32 %v3004_v0, %v2902_v55  ;;  %v3010_v11 = vsel %vm1986_vm4, %v3007_v12, %v3009_v62  ;;  %v4578_v36 = vld [vmem:[%s4645_s26 + $0xf0] sm:$0xff] }
 0x2c2   : > { %v3384_v60 = vmax.f32 %v3347_v13, 0.0  ;;  %v3086_v3 = vadd.f32 %v3010_v11, %v2905_v17  ;;  %v3006_v22 = vsel %vm1986_vm4, %v3003_v47, %v3005_v56  ;;  %v3008_v50 = vsel %vm1986_vm4, %v3005_v56, %v3007_v12 }
 0x2c3   : > { %v3385_v18 = vmax.f32 %v3348_v35, 0.0  ;;  %v3386_v58 = vmax.f32 %v3349_v59, 0.0  ;;  %v3126_v9 = vmul.f32 %v5777_v28, %v3083_v6  ;;  %v3084_v33 = vadd.f32 %v3006_v22, %v2903_v45 }
 0x2c4   : > { %3422 = vst.msk [vmem:[%s5826_s13 + $0xbd] sm:$0xff] %vm662_vm1, %v3384_v60  ;;  %v3129_v1 = vmul.f32 %v5777_v28, %v3086_v3  ;;  %v3085_v21 = vadd.f32 %v3008_v50, %v2904_v5  ;;  %v2830_v19 = vrot.slane %v6136_v8, 1  ;;  %v2836_v12 = vrot.slane %v6143_v31, 1 }
 0x2c5   : > { %3423 = vst.msk [vmem:[%s5826_s13 + $0xc5] sm:$0xff] %vm662_vm1, %v3385_v18  ;;  %3424 = vst.msk [vmem:[%s5826_s13 + $0xcd] sm:$0xff] %vm662_vm1, %v3386_v58  ;;  %v3169_v63 = vadd.f32 %v5786_v43, %v3126_v9  ;;  %v3127_v48 = vmul.f32 %v5777_v28, %v3084_v33  ;;  %v2832_v32 = vrot.slane %v6153_v44, 1  ;;  %v3015_v42 = vrot.slane %v6158_v49, 2 }
 0x2c6   : > { %v6291_v37 = vadd.f32 %v5786_v43, %v3129_v1  ;;  %v3128_v24 = vmul.f32 %v5777_v28, %v3085_v21  ;;  %v2831_v8 = vsel %vm751_vm3, %v2828_v23, %v2830_v19  ;;  %v2837_v55 = vsel %vm751_vm3, %v2834_v41, %v2836_v12 }
 0x2c7   : > { %v3268_v14 = vrot.slane %v3169_v63, 5  ;;  %v3170_v27 = vadd.f32 %v5786_v43, %v3127_v48  ;;  %v2906_v29 = vadd.f32 %v5750_v20, %v2831_v8  ;;  %v2874_v39 = vsel %vm751_vm3, %v2836_v12, 0.0  ;;  %v4577_v20 = vld [vmem:[%s4645_s26 + $0xe8] sm:$0xff] }
 0x2c8   : > { %v3274_v31 = vrot.slane %v6291_v37, 5  ;;  %v3171_v44 = vadd.f32 %v5786_v43, %v3128_v24  ;;  %v2909_v16 = vadd.f32 %v5756_v53, %v2837_v55  ;;  %v2910_v49 = vadd.f32 %v5762_v51, %v2874_v39  ;;  %v4581_v37 = vld [vmem:[%s4645_s26 + $0x108] sm:$0xff] }
 0x2c9   : > { %v3269_v4 = vsel %vm3214_vm5, %v3266_v25, %v3268_v14  ;;  %v3270_v23 = vrot.slane %v3170_v27, 5  ;;  %v2833_v17 = vsel %vm751_vm3, %v2830_v19, %v2832_v32  ;;  %v2835_v45 = vsel %vm751_vm3, %v2832_v32, %v2834_v41  ;;  %v4583_v27 = vld [vmem:[%s4645_s26 + $0x128] sm:$0xff] }
 0x2ca   : > { %v3350_v30 = vadd.f32 %v4577_v20, %v3269_v4  ;;  %v3272_v38 = vrot.slane %v3171_v44, 5  ;;  %v2907_v5 = vadd.f32 %v5759_v57, %v2833_v17  ;;  %v2908_v25 = vadd.f32 %v5765_v54, %v2835_v45  ;;  %v4580_v57 = vld [vmem:[%s4645_s26 + $0x100] sm:$0xff]  ;;  %v4585_v17 = vld [vmem:[%s4645_s26 + $0x118] sm:$0xff] }
 0x2cb   : > { %v3271_v53 = vsel %vm3214_vm5, %v3268_v14, %v3270_v23  ;;  %v3011_v47 = vrot.slane %v6161_v40, 2  ;;  %v3017_v51 = vrot.slane %v6168_v7, 2  ;;  %v3013_v60 = vrot.slane %v6178_v2, 2 }
 0x2cc   : > { %v3387_v61 = vmax.f32 %v3350_v30, 0.0  ;;  %v3273_v34 = vsel %vm3214_vm5, %v3270_v23, %v3272_v38  ;;  %v3275_v56 = vsel %vm3214_vm5, %v3272_v38, %v3274_v31  ;;  %v3351_v15 = vadd.f32 %v4578_v36, %v3271_v53  ;;  %v4584_v23 = vld [vmem:[%s4645_s26 + $0x110] sm:$0xff]  ;;  %v4586_v30 = vld [vmem:[%s4645_s26 + $0x120] sm:$0xff] }
 0x2cd   : > { %v3352_v13 = vadd.f32 %v4579_v26, %v3273_v34  ;;  %v3353_v0 = vadd.f32 %v4580_v57, %v3275_v56  ;;  %v3012_v54 = vsel %vm1986_vm4, %v3009_v62, %v3011_v47  ;;  %v3018_v40 = vsel %vm1986_vm4, %v3015_v42, %v3017_v51 }
 0x2ce   : > { %3425 = vst.msk [vmem:[%s5826_s13 + $0xd5] sm:$0xff] %vm662_vm1, %v3387_v61  ;;  %v3388_v7 = vmax.f32 %v3351_v15, 0.0  ;;  %v3087_v10 = vadd.f32 %v3012_v54, %v2906_v29  ;;  %v3055_v35 = vsel %vm1986_vm4, %v3017_v51, 0.0  ;;  %v3090_v46 = vadd.f32 %v3018_v40, %v2909_v16 }
 0x2cf   : > { %v3389_v59 = vmax.f32 %v3352_v13, 0.0  ;;  %v3390_v6 = vmax.f32 %v3353_v0, 0.0  ;;  %v3091_v11 = vadd.f32 %v3055_v35, %v2910_v49  ;;  %v3014_v22 = vsel %vm1986_vm4, %v3011_v47, %v3013_v60 }
 0x2d0   : > { %3426 = vst.msk [vmem:[%s5826_s13 + $0xdd] sm:$0xff] %vm662_vm1, %v3388_v7  ;;  %v3130_v52 = vmul.f32 %v5777_v28, %v3087_v10  ;;  %v3133_v62 = vmul.f32 %v5777_v28, %v3090_v46  ;;  %v3016_v50 = vsel %vm1986_vm4, %v3013_v60, %v3015_v42  ;;  %v3088_v58 = vadd.f32 %v3014_v22, %v2907_v5  ;;  %v4582_v42 = vld [vmem:[%s4645_s26 + $0x130] sm:$0xff] }
 0x2d1   : > { %3427 = vst.msk [vmem:[%s5826_s13 + $0xe5] sm:$0xff] %vm662_vm1, %v3389_v59  ;;  %3428 = vst.msk [vmem:[%s5826_s13 + $0xed] sm:$0xff] %vm662_vm1, %v3390_v6  ;;  %v3134_v3 = vmul.f32 %v5777_v28, %v3091_v11  ;;  %v3089_v9 = vadd.f32 %v3016_v50, %v2908_v25 }
 0x2d2   : > { %v3173_v18 = vadd.f32 %v5786_v43, %v3130_v52  ;;  %v3176_v2 = vadd.f32 %v5786_v43, %v3133_v62  ;;  %v3131_v41 = vmul.f32 %v5777_v28, %v3088_v58 }
 0x2d3   : > { %v3177_v33 = vadd.f32 %v5786_v43, %v3134_v3  ;;  %v3132_v19 = vmul.f32 %v5777_v28, %v3089_v9 }
 0x2d4   : > { %v3276_v1 = vrot.slane %v3173_v18, 5  ;;  %v3282_v21 = vrot.slane %v3176_v2, 5  ;;  %v3174_v12 = vadd.f32 %v5786_v43, %v3131_v41 }
 0x2d5   : > { %v3284_v63 = vrot.slane %v3177_v33, 5  ;;  %v3175_v32 = vadd.f32 %v5786_v43, %v3132_v19 }
 0x2d6   : > { %v3277_v48 = vsel %vm3214_vm5, %v3274_v31, %v3276_v1  ;;  %v3278_v28 = vrot.slane %v3174_v12, 5 }
 0x2d7   : > { %v3354_v24 = vadd.f32 %v4581_v37, %v3277_v48  ;;  %v3285_v8 = vsel %vm3214_vm5, %v3282_v21, %v3284_v63  ;;  %v3359_v14 = vadd.f32 %v4582_v42, %v3284_v63  ;;  %v3280_v55 = vrot.slane %v3175_v32, 5 }
 0x2d8   : > { %v3358_v29 = vadd.f32 %v4583_v27, %v3285_v8  ;;  %v3279_v39 = vsel %vm3214_vm5, %v3276_v1, %v3278_v28 }
 0x2d9   : > { %v3391_v31 = vmax.f32 %v3354_v24, 0.0  ;;  %v3396_v44 = vmax.f32 %v3359_v14, 0.0  ;;  %v3281_v16 = vsel %vm3214_vm5, %v3278_v28, %v3280_v55  ;;  %v3283_v4 = vsel %vm3214_vm5, %v3280_v55, %v3282_v21 }
 0x2da   : > { %v3395_v43 = vmax.f32 %v3358_v29, 0.0  ;;  %v3355_v49 = vadd.f32 %v4584_v23, %v3279_v39  ;;  %v3356_v20 = vadd.f32 %v4585_v17, %v3281_v16  ;;  %v3357_v38 = vadd.f32 %v4586_v30, %v3283_v4 }
 0x2db   : > { %3429 = vst.msk [vmem:[%s5826_s13 + $0xf5] sm:$0xff] %vm662_vm1, %v3391_v31 }
 0x2dc   : > { %3435 = vst.msk [vmem:[%s5826_s13 + $0x11d] sm:$0x7] %vm3434_vm7, %v3396_v44  ;;  %v3392_v45 = vmax.f32 %v3355_v49, 0.0  ;;  %v3393_v5 = vmax.f32 %v3356_v20, 0.0  ;;  %v3394_v53 = vmax.f32 %v3357_v38, 0.0 }
 0x2dd   : > { %3433 = vst.msk [vmem:[%s5826_s13 + $0x115] sm:$0xff] %vm662_vm1, %v3395_v43 }
 0x2de   : > { %3430 = vst.msk [vmem:[%s5826_s13 + $0xfd] sm:$0xff] %vm662_vm1, %v3392_v45  ;;  %3431 = vst.msk [vmem:[%s5826_s13 + $0x105] sm:$0xff] %vm662_vm1, %v3393_v5 }
 0x2df   : > { %3432 = vst.msk [vmem:[%s5826_s13 + $0x10d] sm:$0xff] %vm662_vm1, %v3394_v53 }
 0x2e0 PF: > { %s16_s21 = sadd.s32 1, %s4593_s21  }
 0x2e1   : > { %p13_p4 = scmp.ge.s32.totalorder %s16_s21, 4  }
 0x2e3   :  { %15 = sbr.rel (!%p13_p4) target bundleno = 1 (0x1), region = 88 }

</bundles_post_ra>
